<compile_context>
chip_gen: v6e
topology: v6e:2x2x1
jax: 0.10.0
libtpu: 0.0.40
codegen_flags: <defaults>
</compile_context>

<pallas_src>
import functools

import jax
import jax.numpy as jnp
from jax.experimental import pallas as pl
from jax.experimental.pallas import tpu as pltpu


LEAKY_SLOPE = 0.05


def _leaky(x, slope=LEAKY_SLOPE):
    return jnp.where(x >= 0, x, slope * x)


def _round_up(x, m):
    return ((x + m - 1) // m) * m


def _rgadj_kernel(num_hidden, edge_outdim, node_seg, edge_seg, *refs):
    """refs = z, (W_i, b_i) * num_hidden, W_fused, b_fused, out."""
    idx = 0
    z_ref = refs[idx]; idx += 1
    hidden = []
    for _ in range(num_hidden):
        hidden.append((refs[idx], refs[idx + 1]))
        idx += 2
    wf_ref, bf_ref = refs[idx], refs[idx + 1]; idx += 2
    out_ref = refs[idx]

    # MLP trunk: bf16 operands into the MXU, f32 accumulation, f32 epilogue.
    h = z_ref[...]
    for w_ref, b_ref in hidden:
        acc = jnp.dot(h.astype(jnp.bfloat16), w_ref[...],
                      preferred_element_type=jnp.float32) + b_ref[...]
        h = _leaky(acc)

    # One fused head matmul.  Fused column layout (all segments 128-aligned,
    # pad columns have zero weight/bias):
    #   [0, node_seg)                             node head (N*node_outdim real)
    #   [node_seg + 2*e*edge_seg, +edge_seg)      edge head a_ij, class e (cols (i,j))
    #   [node_seg + (2*e+1)*edge_seg, +edge_seg)  edge head a_ji, class e (cols (j,i))
    # The 0.5 symmetrization factor is pre-folded into the edge weights/bias.
    t = jnp.dot(h.astype(jnp.bfloat16), wf_ref[...],
                preferred_element_type=jnp.float32) + bf_ref[...]

    # Node head: raw linear output (no activation).  Aligned, unmasked store.
    out_ref[:, :node_seg] = t[:, :node_seg]

    # Edge head: leaky_relu, symmetrize over (i, j), softmax over edge_outdim.
    s = []
    for e in range(edge_outdim):
        off = node_seg + 2 * e * edge_seg
        a_ij = _leaky(t[:, off:off + edge_seg])
        a_ji = _leaky(t[:, off + edge_seg:off + 2 * edge_seg])
        s.append(a_ij + a_ji)          # 0.5 already folded into the weights

    if edge_outdim == 2:
        # Two-class softmax == sigmoid of the difference: one exp, no max/sum.
        p0 = jax.nn.sigmoid(s[0] - s[1])
        probs = [p0, 1.0 - p0]
    else:
        m = s[0]
        for e in range(1, edge_outdim):
            m = jnp.maximum(m, s[e])
        exps = [jnp.exp(v - m) for v in s]
        denom = exps[0]
        for e in range(1, edge_outdim):
            denom = denom + exps[e]
        inv = 1.0 / denom              # exact: probabilities sum to 1
        probs = [v * inv for v in exps]

    # Output slab: [node_seg | probs_0 | probs_1 | ...], all 128-aligned stores.
    for e in range(edge_outdim):
        off = node_seg + e * edge_seg
        out_ref[:, off:off + edge_seg] = probs[e]


def init_params(key, in_dim, hidden_dims, nodeNum, node_outdim, edge_outdim):
    """nn.Linear-style init U(-1/sqrt(fan_in), 1/sqrt(fan_in)) + kernel glue."""
    params = {}

    def linear(key, fan_in, fan_out):
        k1, k2 = jax.random.split(key)
        bound = 1.0 / jnp.sqrt(jnp.float32(fan_in))
        w = jax.random.uniform(k1, (fan_in, fan_out), jnp.float32, -bound, bound)
        b = jax.random.uniform(k2, (1, fan_out), jnp.float32, -bound, bound)
        return w, b

    pre = in_dim
    raw_hidden = []
    for j in hidden_dims:
        key, sub = jax.random.split(key)
        raw_hidden.append(linear(sub, pre, j))
        pre = j

    key, sub = jax.random.split(key)
    wn, bn = linear(sub, pre, nodeNum * node_outdim)
    key, sub = jax.random.split(key)
    we, be = linear(sub, pre, nodeNum * nodeNum * edge_outdim)

    # Raw (PyTorch-layout) params kept for the pure-JAX reference.
    params["hidden_raw"] = raw_hidden
    params["wn"], params["bn"] = wn, bn
    params["we"], params["be"] = we, be

    # ---- kernel-side glue --------------------------------------------------
    # (a) pad hidden widths to multiples of 128 so h stays lane-dense
    #     (exact: padded cols are zero, padded rows of the next layer are zero)
    # (b) cast MXU weight operands to bf16 (biases stay f32: tiny, added to
    #     the f32 accumulator).
    pre_real, pre_pad = in_dim, in_dim
    padded_hidden = []
    for (w, b) in raw_hidden:
        fan_in, fan_out = w.shape
        out_pad = _round_up(fan_out, 128)
        wp = jnp.zeros((pre_pad, out_pad), jnp.float32).at[:fan_in, :fan_out].set(w)
        bp = jnp.zeros((1, out_pad), jnp.float32).at[:, :fan_out].set(b)
        padded_hidden.append((wp.astype(jnp.bfloat16), bp))
        pre_real, pre_pad = fan_out, out_pad
    params["hidden"] = padded_hidden

    # ---- fused, lane-dense head layout ------------------------------------
    N, E, H, H_pad = nodeNum, edge_outdim, pre_real, pre_pad
    NN = N * N
    node_cols = N * node_outdim
    node_seg = _round_up(node_cols, 128)
    edge_seg = _round_up(NN, 128)

    def pad_block(x, rows, cols):
        out = jnp.zeros((rows, cols), jnp.float32)
        return out.at[:x.shape[0], :x.shape[1]].set(x)

    we4 = we.reshape(H, N, N, E)                                 # (H, i, j, e)
    # Fold the 0.5 symmetrization factor into the edge head (leaky_relu is
    # positively homogeneous), so the kernel epilogue skips that multiply.
    wea = 0.5 * we4.transpose(3, 0, 1, 2).reshape(E, H, NN)      # cols (i, j)
    web = 0.5 * we4.transpose(3, 0, 2, 1).reshape(E, H, NN)      # cols (j, i)
    be3 = be.reshape(N, N, E)
    bea = 0.5 * be3.transpose(2, 0, 1).reshape(E, 1, NN)
    beb = 0.5 * be3.transpose(2, 1, 0).reshape(E, 1, NN)

    w_pieces = [pad_block(wn, H_pad, node_seg)]
    b_pieces = [pad_block(bn, 1, node_seg)]
    for e in range(E):
        w_pieces += [pad_block(wea[e], H_pad, edge_seg),
                     pad_block(web[e], H_pad, edge_seg)]
        b_pieces += [pad_block(bea[e], 1, edge_seg),
                     pad_block(beb[e], 1, edge_seg)]
    params["w_fused"] = jnp.concatenate(w_pieces, axis=1).astype(jnp.bfloat16)
    params["b_fused"] = jnp.concatenate(b_pieces, axis=1)        # f32
    return params


@functools.partial(
    jax.jit,
    static_argnames=("nodeNum", "node_outdim", "edge_outdim", "single_buffer_weights"))
def rgadj_forward_node_edge(z, params, *, nodeNum, node_outdim, edge_outdim,
                            single_buffer_weights=True):
    B, in_dim = z.shape
    N, E = nodeNum, edge_outdim
    NN = N * N
    node_cols = N * node_outdim
    node_seg = _round_up(node_cols, 128)
    edge_seg = _round_up(NN, 128)
    out_cols = node_seg + E * edge_seg
    num_hidden = len(params["hidden"])
    H_pad, fused_cols = params["w_fused"].shape

    # Batch tiling:
    #  * tiny B: a single 8-row tile
    #  * B >= 16: two grid steps so v7x's second TensorCore gets work
    #  * large B: 256-row tiles to fill the v6e/v7x 256x256 MXU
    #    (v5e just takes two 128-row MXU passes per tile).
    B8 = _round_up(B, 8)
    if B8 <= 8:
        tb = 8
    elif B8 <= 512:
        tb = _round_up((B8 + 1) // 2, 8)
    else:
        tb = 256
    B_pad = _round_up(B8, tb)
    zp = z if B_pad == B else jnp.pad(z, ((0, B_pad - B), (0, 0)))

    # Weights/biases use a constant index_map (VMEM-resident); request a
    # single buffer so they are not pointlessly double-buffered.
    wkw = dict(pipeline_mode=pl.Buffered(1)) if single_buffer_weights else {}

    inputs = [zp]
    in_specs = [pl.BlockSpec((tb, in_dim), lambda i: (i, 0))]
    for w, b in params["hidden"]:
        inputs += [w, b]
        in_specs += [
            pl.BlockSpec(w.shape, lambda i: (0, 0), **wkw),
            pl.BlockSpec(b.shape, lambda i: (0, 0), **wkw),
        ]
    inputs += [params["w_fused"], params["b_fused"]]
    in_specs += [
        pl.BlockSpec((H_pad, fused_cols), lambda i: (0, 0), **wkw),
        pl.BlockSpec((1, fused_cols), lambda i: (0, 0), **wkw),
    ]

    # Explicit VMEM budget: weights (+margin) + pipelined z/out tiles + the
    # fused matmul result slab and epilogue temporaries.
    weight_bytes = 0
    for w, b in params["hidden"]:
        weight_bytes += w.size * w.dtype.itemsize + b.size * b.dtype.itemsize
    weight_bytes += (params["w_fused"].size * params["w_fused"].dtype.itemsize
                     + params["b_fused"].size * params["b_fused"].dtype.itemsize)
    est = (2 * weight_bytes
           + 2 * tb * in_dim * 4
           + 2 * tb * out_cols * 4
           + 4 * tb * fused_cols * 4)
    vmem_limit = int(min(64 * 1024 * 1024, max(24 * 1024 * 1024, 2 * est)))

    kernel = functools.partial(_rgadj_kernel, num_hidden, E, node_seg, edge_seg)

    out = pl.pallas_call(
        kernel,
        out_shape=jax.ShapeDtypeStruct((B_pad, out_cols), jnp.float32),
        grid=(B_pad // tb,),
        in_specs=in_specs,
        out_specs=pl.BlockSpec((tb, out_cols), lambda i: (i, 0)),
        compiler_params=pltpu.CompilerParams(
            dimension_semantics=("parallel",),
            vmem_limit_bytes=vmem_limit),
    )(*inputs)

    out = out[:B]
    out_X = out[:, :node_cols].reshape(B, N, node_outdim)
    a_parts = [out[:, node_seg + e * edge_seg: node_seg + e * edge_seg + NN]
               for e in range(E)]
    # TODO(synk): fusing the downstream Gumbel-softmax sampling into the kernel
    # epilogue would avoid this extra pass over the edge slab entirely.
    out_A = jnp.stack(a_parts, axis=-1).reshape(B, N, N, E)
    return out_X, out_A


def rgadj_reference(z, params, nodeNum, node_outdim, edge_outdim):
    """Pure-JAX reference for generate_XA, mirroring the kernel's mixed
    precision (bf16 MXU operands, f32 accumulation / f32 epilogue)."""
    bf16 = jnp.bfloat16
    h = z
    for w, b in params["hidden_raw"]:
        h = _leaky(jnp.dot(h.astype(bf16), w.astype(bf16),
                           preferred_element_type=jnp.float32) + b)
    out_X = (jnp.dot(h.astype(bf16), params["wn"].astype(bf16),
                     preferred_element_type=jnp.float32) + params["bn"]
             ).reshape(-1, nodeNum, node_outdim)
    out_A = _leaky(jnp.dot(h.astype(bf16), params["we"].astype(bf16),
                           preferred_element_type=jnp.float32) + params["be"]
                   ).reshape(-1, nodeNum, nodeNum, edge_outdim)
    out_A = (out_A + jnp.transpose(out_A, (0, 2, 1, 3))) / 2.0
    out_A = jax.nn.softmax(out_A, axis=-1)
    return out_X, out_A


def _call_forward(z, params, **kw):
    """Prefer single-buffered weight BlockSpecs (pl.Buffered(1)); fall back to
    default double buffering if this build rejects that pipeline mode."""
    try:
        out = rgadj_forward_node_edge(z, params, single_buffer_weights=True, **kw)
        return jax.block_until_ready(out)
    except Exception:
        out = rgadj_forward_node_edge(z, params, single_buffer_weights=False, **kw)
        return jax.block_until_ready(out)


if __name__ == "__main__":
    in_dim = 32
    hidden_dims = [64, 128, 32, 32]
    nodeNum = 12
    node_outdim = 2
    edge_outdim = 2

    key = jax.random.PRNGKey(0)
    kz, kp = jax.random.split(key)
    params = init_params(kp, in_dim, hidden_dims, nodeNum, node_outdim, edge_outdim)

    for B in (8, 20):  # single-tile path and padded 2-step (megacore) path
        z = jax.random.normal(jax.random.fold_in(kz, B), (B, in_dim),
                              dtype=jnp.float32)
        out_X, out_A = _call_forward(z, params, nodeNum=nodeNum,
                                     node_outdim=node_outdim,
                                     edge_outdim=edge_outdim)
        ref_X, ref_A = rgadj_reference(z, params, nodeNum, node_outdim, edge_outdim)

        assert out_X.shape == (B, nodeNum, node_outdim)
        assert out_A.shape == (B, nodeNum, nodeNum, edge_outdim)
        assert jnp.allclose(out_X, ref_X, atol=2e-3, rtol=2e-3)
        assert jnp.allclose(out_A, ref_A, atol=2e-3, rtol=2e-3)
        # softmax rows sum to 1
        assert jnp.allclose(out_A.sum(-1), jnp.ones((B, nodeNum, nodeNum)),
                            atol=1e-5)

    print("KERNEL_OK")
</pallas_src>

<mosaic_0001>
module attributes {stable_mosaic.version = 11 : i64} {
  func.func @_rgadj_kernel(%arg0: i32, %arg1: memref<8x32xf32, #tpu.memory_space<vmem>>, %arg2: memref<32x128xbf16, #tpu.memory_space<vmem>>, %arg3: memref<1x128xf32, #tpu.memory_space<vmem>>, %arg4: memref<128x128xbf16, #tpu.memory_space<vmem>>, %arg5: memref<1x128xf32, #tpu.memory_space<vmem>>, %arg6: memref<128x128xbf16, #tpu.memory_space<vmem>>, %arg7: memref<1x128xf32, #tpu.memory_space<vmem>>, %arg8: memref<128x128xbf16, #tpu.memory_space<vmem>>, %arg9: memref<1x128xf32, #tpu.memory_space<vmem>>, %arg10: memref<128x1152xbf16, #tpu.memory_space<vmem>>, %arg11: memref<1x1152xf32, #tpu.memory_space<vmem>>, %arg12: memref<8x640xf32, #tpu.memory_space<vmem>>) attributes {dimension_semantics = [#tpu.dimension_semantics<parallel>], iteration_bounds = array<i64: 1>, scalar_prefetch = 0 : i64, scratch_operands = 0 : i64, tpu.core_type = #tpu.core_type<tc>, window_params = [{transform_indices = @transform_0, window_bounds = array<i64: 8, 32>}, {pipeline_mode = #tpu.pipeline_mode<synchronous>, transform_indices = @transform_1, window_bounds = array<i64: 32, 128>}, {pipeline_mode = #tpu.pipeline_mode<synchronous>, transform_indices = @transform_2, window_bounds = array<i64: 1, 128>}, {pipeline_mode = #tpu.pipeline_mode<synchronous>, transform_indices = @transform_3, window_bounds = array<i64: 128, 128>}, {pipeline_mode = #tpu.pipeline_mode<synchronous>, transform_indices = @transform_4, window_bounds = array<i64: 1, 128>}, {pipeline_mode = #tpu.pipeline_mode<synchronous>, transform_indices = @transform_5, window_bounds = array<i64: 128, 128>}, {pipeline_mode = #tpu.pipeline_mode<synchronous>, transform_indices = @transform_6, window_bounds = array<i64: 1, 128>}, {pipeline_mode = #tpu.pipeline_mode<synchronous>, transform_indices = @transform_7, window_bounds = array<i64: 128, 128>}, {pipeline_mode = #tpu.pipeline_mode<synchronous>, transform_indices = @transform_8, window_bounds = array<i64: 1, 128>}, {pipeline_mode = #tpu.pipeline_mode<synchronous>, transform_indices = @transform_9, window_bounds = array<i64: 128, 1152>}, {pipeline_mode = #tpu.pipeline_mode<synchronous>, transform_indices = @transform_10, window_bounds = array<i64: 1, 1152>}, {transform_indices = @transform_11, window_bounds = array<i64: 8, 640>}]} {
    %c0 = arith.constant 0 : index
    %c0_0 = arith.constant 0 : index
    %0 = vector.load %arg1[%c0, %c0_0] : memref<8x32xf32, #tpu.memory_space<vmem>>, vector<8x32xf32>
    %1 = arith.truncf %0 : vector<8x32xf32> to vector<8x32xbf16>
    %c0_1 = arith.constant 0 : index
    %c0_2 = arith.constant 0 : index
    %2 = vector.load %arg2[%c0_1, %c0_2] : memref<32x128xbf16, #tpu.memory_space<vmem>>, vector<32x128xbf16>
    %cst = arith.constant dense<0.000000e+00> : vector<8x128xf32>
    %3 = tpu.matmul %1, %2, %cst {dimension_numbers = #tpu.dot_dimension_numbers<[1], [0], [0], [1], [0, 0, 1, 1], [], []>} : vector<8x32xbf16>, vector<32x128xbf16>, vector<8x128xf32> -> vector<8x128xf32>
    %c0_3 = arith.constant 0 : index
    %c0_4 = arith.constant 0 : index
    %4 = vector.load %arg3[%c0_3, %c0_4] : memref<1x128xf32, #tpu.memory_space<vmem>>, vector<1x128xf32>
    %5 = vector.broadcast %4 : vector<1x128xf32> to vector<8x128xf32>
    %6 = arith.addf %3, %5 : vector<8x128xf32>
    %cst_5 = arith.constant 0.000000e+00 : f32
    %7 = vector.broadcast %cst_5 : f32 to vector<8x128xf32>
    %8 = arith.cmpf oge, %6, %7 : vector<8x128xf32>
    %cst_6 = arith.constant 5.000000e-02 : f32
    %9 = vector.broadcast %cst_6 : f32 to vector<8x128xf32>
    %10 = arith.mulf %9, %6 : vector<8x128xf32>
    %11 = arith.select %8, %6, %10 : vector<8x128xi1>, vector<8x128xf32>
    %12 = arith.truncf %11 : vector<8x128xf32> to vector<8x128xbf16>
    %c0_7 = arith.constant 0 : index
    %c0_8 = arith.constant 0 : index
    %13 = vector.load %arg4[%c0_7, %c0_8] : memref<128x128xbf16, #tpu.memory_space<vmem>>, vector<128x128xbf16>
    %cst_9 = arith.constant dense<0.000000e+00> : vector<8x128xf32>
    %14 = tpu.matmul %12, %13, %cst_9 {dimension_numbers = #tpu.dot_dimension_numbers<[1], [0], [0], [1], [0, 0, 1, 1], [], []>} : vector<8x128xbf16>, vector<128x128xbf16>, vector<8x128xf32> -> vector<8x128xf32>
    %c0_10 = arith.constant 0 : index
    %c0_11 = arith.constant 0 : index
    %15 = vector.load %arg5[%c0_10, %c0_11] : memref<1x128xf32, #tpu.memory_space<vmem>>, vector<1x128xf32>
    %16 = vector.broadcast %15 : vector<1x128xf32> to vector<8x128xf32>
    %17 = arith.addf %14, %16 : vector<8x128xf32>
    %cst_12 = arith.constant 0.000000e+00 : f32
    %18 = vector.broadcast %cst_12 : f32 to vector<8x128xf32>
    %19 = arith.cmpf oge, %17, %18 : vector<8x128xf32>
    %cst_13 = arith.constant 5.000000e-02 : f32
    %20 = vector.broadcast %cst_13 : f32 to vector<8x128xf32>
    %21 = arith.mulf %20, %17 : vector<8x128xf32>
    %22 = arith.select %19, %17, %21 : vector<8x128xi1>, vector<8x128xf32>
    %23 = arith.truncf %22 : vector<8x128xf32> to vector<8x128xbf16>
    %c0_14 = arith.constant 0 : index
    %c0_15 = arith.constant 0 : index
    %24 = vector.load %arg6[%c0_14, %c0_15] : memref<128x128xbf16, #tpu.memory_space<vmem>>, vector<128x128xbf16>
    %cst_16 = arith.constant dense<0.000000e+00> : vector<8x128xf32>
    %25 = tpu.matmul %23, %24, %cst_16 {dimension_numbers = #tpu.dot_dimension_numbers<[1], [0], [0], [1], [0, 0, 1, 1], [], []>} : vector<8x128xbf16>, vector<128x128xbf16>, vector<8x128xf32> -> vector<8x128xf32>
    %c0_17 = arith.constant 0 : index
    %c0_18 = arith.constant 0 : index
    %26 = vector.load %arg7[%c0_17, %c0_18] : memref<1x128xf32, #tpu.memory_space<vmem>>, vector<1x128xf32>
    %27 = vector.broadcast %26 : vector<1x128xf32> to vector<8x128xf32>
    %28 = arith.addf %25, %27 : vector<8x128xf32>
    %cst_19 = arith.constant 0.000000e+00 : f32
    %29 = vector.broadcast %cst_19 : f32 to vector<8x128xf32>
    %30 = arith.cmpf oge, %28, %29 : vector<8x128xf32>
    %cst_20 = arith.constant 5.000000e-02 : f32
    %31 = vector.broadcast %cst_20 : f32 to vector<8x128xf32>
    %32 = arith.mulf %31, %28 : vector<8x128xf32>
    %33 = arith.select %30, %28, %32 : vector<8x128xi1>, vector<8x128xf32>
    %34 = arith.truncf %33 : vector<8x128xf32> to vector<8x128xbf16>
    %c0_21 = arith.constant 0 : index
    %c0_22 = arith.constant 0 : index
    %35 = vector.load %arg8[%c0_21, %c0_22] : memref<128x128xbf16, #tpu.memory_space<vmem>>, vector<128x128xbf16>
    %cst_23 = arith.constant dense<0.000000e+00> : vector<8x128xf32>
    %36 = tpu.matmul %34, %35, %cst_23 {dimension_numbers = #tpu.dot_dimension_numbers<[1], [0], [0], [1], [0, 0, 1, 1], [], []>} : vector<8x128xbf16>, vector<128x128xbf16>, vector<8x128xf32> -> vector<8x128xf32>
    %c0_24 = arith.constant 0 : index
    %c0_25 = arith.constant 0 : index
    %37 = vector.load %arg9[%c0_24, %c0_25] : memref<1x128xf32, #tpu.memory_space<vmem>>, vector<1x128xf32>
    %38 = vector.broadcast %37 : vector<1x128xf32> to vector<8x128xf32>
    %39 = arith.addf %36, %38 : vector<8x128xf32>
    %cst_26 = arith.constant 0.000000e+00 : f32
    %40 = vector.broadcast %cst_26 : f32 to vector<8x128xf32>
    %41 = arith.cmpf oge, %39, %40 : vector<8x128xf32>
    %cst_27 = arith.constant 5.000000e-02 : f32
    %42 = vector.broadcast %cst_27 : f32 to vector<8x128xf32>
    %43 = arith.mulf %42, %39 : vector<8x128xf32>
    %44 = arith.select %41, %39, %43 : vector<8x128xi1>, vector<8x128xf32>
    %45 = arith.truncf %44 : vector<8x128xf32> to vector<8x128xbf16>
    %c0_28 = arith.constant 0 : index
    %c0_29 = arith.constant 0 : index
    %46 = vector.load %arg10[%c0_28, %c0_29] : memref<128x1152xbf16, #tpu.memory_space<vmem>>, vector<128x1152xbf16>
    %cst_30 = arith.constant dense<0.000000e+00> : vector<8x1152xf32>
    %47 = tpu.matmul %45, %46, %cst_30 {dimension_numbers = #tpu.dot_dimension_numbers<[1], [0], [0], [1], [0, 0, 1, 1], [], []>} : vector<8x128xbf16>, vector<128x1152xbf16>, vector<8x1152xf32> -> vector<8x1152xf32>
    %c0_31 = arith.constant 0 : index
    %c0_32 = arith.constant 0 : index
    %48 = vector.load %arg11[%c0_31, %c0_32] : memref<1x1152xf32, #tpu.memory_space<vmem>>, vector<1x1152xf32>
    %49 = vector.broadcast %48 : vector<1x1152xf32> to vector<8x1152xf32>
    %50 = arith.addf %47, %49 : vector<8x1152xf32>
    %51 = vector.extract_strided_slice %50 {offsets = [0, 0], sizes = [8, 128], strides = [1, 1]} : vector<8x1152xf32> to vector<8x128xf32>
    %c0_33 = arith.constant 0 : index
    %c0_34 = arith.constant 0 : index
    %52 = vector.load %arg12[%c0_33, %c0_34] : memref<8x640xf32, #tpu.memory_space<vmem>>, vector<8x128xf32>
    tpu.vector_store %arg12[%c0_33, %c0_34], %51 {strides = array<i32>} : memref<8x640xf32, #tpu.memory_space<vmem>>, vector<8x128xf32>,
    %53 = vector.extract_strided_slice %50 {offsets = [0, 128], sizes = [8, 256], strides = [1, 1]} : vector<8x1152xf32> to vector<8x256xf32>
    %cst_35 = arith.constant 0.000000e+00 : f32
    %54 = vector.broadcast %cst_35 : f32 to vector<8x256xf32>
    %55 = arith.cmpf oge, %53, %54 : vector<8x256xf32>
    %cst_36 = arith.constant 5.000000e-02 : f32
    %56 = vector.broadcast %cst_36 : f32 to vector<8x256xf32>
    %57 = arith.mulf %56, %53 : vector<8x256xf32>
    %58 = arith.select %55, %53, %57 : vector<8x256xi1>, vector<8x256xf32>
    %59 = vector.extract_strided_slice %50 {offsets = [0, 384], sizes = [8, 256], strides = [1, 1]} : vector<8x1152xf32> to vector<8x256xf32>
    %cst_37 = arith.constant 0.000000e+00 : f32
    %60 = vector.broadcast %cst_37 : f32 to vector<8x256xf32>
    %61 = arith.cmpf oge, %59, %60 : vector<8x256xf32>
    %cst_38 = arith.constant 5.000000e-02 : f32
    %62 = vector.broadcast %cst_38 : f32 to vector<8x256xf32>
    %63 = arith.mulf %62, %59 : vector<8x256xf32>
    %64 = arith.select %61, %59, %63 : vector<8x256xi1>, vector<8x256xf32>
    %65 = arith.addf %58, %64 : vector<8x256xf32>
    %66 = vector.extract_strided_slice %50 {offsets = [0, 640], sizes = [8, 256], strides = [1, 1]} : vector<8x1152xf32> to vector<8x256xf32>
    %cst_39 = arith.constant 0.000000e+00 : f32
    %67 = vector.broadcast %cst_39 : f32 to vector<8x256xf32>
    %68 = arith.cmpf oge, %66, %67 : vector<8x256xf32>
    %cst_40 = arith.constant 5.000000e-02 : f32
    %69 = vector.broadcast %cst_40 : f32 to vector<8x256xf32>
    %70 = arith.mulf %69, %66 : vector<8x256xf32>
    %71 = arith.select %68, %66, %70 : vector<8x256xi1>, vector<8x256xf32>
    %72 = vector.extract_strided_slice %50 {offsets = [0, 896], sizes = [8, 256], strides = [1, 1]} : vector<8x1152xf32> to vector<8x256xf32>
    %cst_41 = arith.constant 0.000000e+00 : f32
    %73 = vector.broadcast %cst_41 : f32 to vector<8x256xf32>
    %74 = arith.cmpf oge, %72, %73 : vector<8x256xf32>
    %cst_42 = arith.constant 5.000000e-02 : f32
    %75 = vector.broadcast %cst_42 : f32 to vector<8x256xf32>
    %76 = arith.mulf %75, %72 : vector<8x256xf32>
    %77 = arith.select %74, %72, %76 : vector<8x256xi1>, vector<8x256xf32>
    %78 = arith.addf %71, %77 : vector<8x256xf32>
    %79 = arith.subf %65, %78 : vector<8x256xf32>
    %80 = arith.negf %79 : vector<8x256xf32>
    %81 = math.exp %80 : vector<8x256xf32>
    %cst_43 = arith.constant 1.000000e+00 : f32
    %82 = vector.broadcast %cst_43 : f32 to vector<8x256xf32>
    %83 = arith.addf %82, %81 : vector<8x256xf32>
    %84 = arith.divf %82, %83 : vector<8x256xf32>
    %cst_44 = arith.constant 1.000000e+00 : f32
    %85 = vector.broadcast %cst_44 : f32 to vector<8x256xf32>
    %86 = arith.subf %85, %84 : vector<8x256xf32>
    %c0_45 = arith.constant 0 : index
    %c128 = arith.constant 128 : index
    %87 = vector.load %arg12[%c0_45, %c128] : memref<8x640xf32, #tpu.memory_space<vmem>>, vector<8x256xf32>
    tpu.vector_store %arg12[%c0_45, %c128], %84 {strides = array<i32>} : memref<8x640xf32, #tpu.memory_space<vmem>>, vector<8x256xf32>,
    %c0_46 = arith.constant 0 : index
    %c384 = arith.constant 384 : index
    %88 = vector.load %arg12[%c0_46, %c384] : memref<8x640xf32, #tpu.memory_space<vmem>>, vector<8x256xf32>
    tpu.vector_store %arg12[%c0_46, %c384], %86 {strides = array<i32>} : memref<8x640xf32, #tpu.memory_space<vmem>>, vector<8x256xf32>,
    return
  }
  func.func @transform_0(%arg0: i32) -> (i32, i32) {
    %c0_i32 = arith.constant 0 : i32
    %c0_i32_0 = arith.constant 0 : i32
    return %arg0, %c0_i32 : i32, i32
  }
  func.func @transform_1(%arg0: i32) -> (i32, i32) {
    %c0_i32 = arith.constant 0 : i32
    %c0_i32_0 = arith.constant 0 : i32
    %c0_i32_1 = arith.constant 0 : i32
    return %c0_i32, %c0_i32_0 : i32, i32
  }
  func.func @transform_2(%arg0: i32) -> (i32, i32) {
    %c0_i32 = arith.constant 0 : i32
    %c0_i32_0 = arith.constant 0 : i32
    %c0_i32_1 = arith.constant 0 : i32
    return %c0_i32, %c0_i32_0 : i32, i32
  }
  func.func @transform_3(%arg0: i32) -> (i32, i32) {
    %c0_i32 = arith.constant 0 : i32
    %c0_i32_0 = arith.constant 0 : i32
    %c0_i32_1 = arith.constant 0 : i32
    return %c0_i32, %c0_i32_0 : i32, i32
  }
  func.func @transform_4(%arg0: i32) -> (i32, i32) {
    %c0_i32 = arith.constant 0 : i32
    %c0_i32_0 = arith.constant 0 : i32
    %c0_i32_1 = arith.constant 0 : i32
    return %c0_i32, %c0_i32_0 : i32, i32
  }
  func.func @transform_5(%arg0: i32) -> (i32, i32) {
    %c0_i32 = arith.constant 0 : i32
    %c0_i32_0 = arith.constant 0 : i32
    %c0_i32_1 = arith.constant 0 : i32
    return %c0_i32, %c0_i32_0 : i32, i32
  }
  func.func @transform_6(%arg0: i32) -> (i32, i32) {
    %c0_i32 = arith.constant 0 : i32
    %c0_i32_0 = arith.constant 0 : i32
    %c0_i32_1 = arith.constant 0 : i32
    return %c0_i32, %c0_i32_0 : i32, i32
  }
  func.func @transform_7(%arg0: i32) -> (i32, i32) {
    %c0_i32 = arith.constant 0 : i32
    %c0_i32_0 = arith.constant 0 : i32
    %c0_i32_1 = arith.constant 0 : i32
    return %c0_i32, %c0_i32_0 : i32, i32
  }
  func.func @transform_8(%arg0: i32) -> (i32, i32) {
    %c0_i32 = arith.constant 0 : i32
    %c0_i32_0 = arith.constant 0 : i32
    %c0_i32_1 = arith.constant 0 : i32
    return %c0_i32, %c0_i32_0 : i32, i32
  }
  func.func @transform_9(%arg0: i32) -> (i32, i32) {
    %c0_i32 = arith.constant 0 : i32
    %c0_i32_0 = arith.constant 0 : i32
    %c0_i32_1 = arith.constant 0 : i32
    return %c0_i32, %c0_i32_0 : i32, i32
  }
  func.func @transform_10(%arg0: i32) -> (i32, i32) {
    %c0_i32 = arith.constant 0 : i32
    %c0_i32_0 = arith.constant 0 : i32
    %c0_i32_1 = arith.constant 0 : i32
    return %c0_i32, %c0_i32_0 : i32, i32
  }
  func.func @transform_11(%arg0: i32) -> (i32, i32) {
    %c0_i32 = arith.constant 0 : i32
    %c0_i32_0 = arith.constant 0 : i32
    return %arg0, %c0_i32 : i32, i32
  }
}

module attributes {stable_mosaic.version = 11 : i64} {
  func.func @_rgadj_kernel(%arg0: i32, %arg1: memref<8x32xf32, #tpu.memory_space<vmem>>, %arg2: memref<32x128xbf16, #tpu.memory_space<vmem>>, %arg3: memref<1x128xf32, #tpu.memory_space<vmem>>, %arg4: memref<128x128xbf16, #tpu.memory_space<vmem>>, %arg5: memref<1x128xf32, #tpu.memory_space<vmem>>, %arg6: memref<128x128xbf16, #tpu.memory_space<vmem>>, %arg7: memref<1x128xf32, #tpu.memory_space<vmem>>, %arg8: memref<128x128xbf16, #tpu.memory_space<vmem>>, %arg9: memref<1x128xf32, #tpu.memory_space<vmem>>, %arg10: memref<128x1152xbf16, #tpu.memory_space<vmem>>, %arg11: memref<1x1152xf32, #tpu.memory_space<vmem>>, %arg12: memref<8x640xf32, #tpu.memory_space<vmem>>) attributes {dimension_semantics = [#tpu.dimension_semantics<parallel>], iteration_bounds = array<i64: 1>, scalar_prefetch = 0 : i64, scratch_operands = 0 : i64, tpu.core_type = #tpu.core_type<tc>, window_params = [{transform_indices = @transform_0, window_bounds = array<i64: 8, 32>}, {pipeline_mode = #tpu.pipeline_mode<synchronous>, transform_indices = @transform_1, window_bounds = array<i64: 32, 128>}, {pipeline_mode = #tpu.pipeline_mode<synchronous>, transform_indices = @transform_2, window_bounds = array<i64: 1, 128>}, {pipeline_mode = #tpu.pipeline_mode<synchronous>, transform_indices = @transform_3, window_bounds = array<i64: 128, 128>}, {pipeline_mode = #tpu.pipeline_mode<synchronous>, transform_indices = @transform_4, window_bounds = array<i64: 1, 128>}, {pipeline_mode = #tpu.pipeline_mode<synchronous>, transform_indices = @transform_5, window_bounds = array<i64: 128, 128>}, {pipeline_mode = #tpu.pipeline_mode<synchronous>, transform_indices = @transform_6, window_bounds = array<i64: 1, 128>}, {pipeline_mode = #tpu.pipeline_mode<synchronous>, transform_indices = @transform_7, window_bounds = array<i64: 128, 128>}, {pipeline_mode = #tpu.pipeline_mode<synchronous>, transform_indices = @transform_8, window_bounds = array<i64: 1, 128>}, {pipeline_mode = #tpu.pipeline_mode<synchronous>, transform_indices = @transform_9, window_bounds = array<i64: 128, 1152>}, {pipeline_mode = #tpu.pipeline_mode<synchronous>, transform_indices = @transform_10, window_bounds = array<i64: 1, 1152>}, {transform_indices = @transform_11, window_bounds = array<i64: 8, 640>}]} {
    %c0 = arith.constant 0 : index
    %c0_0 = arith.constant 0 : index
    %0 = vector.load %arg1[%c0, %c0_0] : memref<8x32xf32, #tpu.memory_space<vmem>>, vector<8x32xf32>
    %1 = arith.truncf %0 : vector<8x32xf32> to vector<8x32xbf16>
    %c0_1 = arith.constant 0 : index
    %c0_2 = arith.constant 0 : index
    %2 = vector.load %arg2[%c0_1, %c0_2] : memref<32x128xbf16, #tpu.memory_space<vmem>>, vector<32x128xbf16>
    %cst = arith.constant dense<0.000000e+00> : vector<8x128xf32>
    %3 = tpu.matmul %1, %2, %cst {dimension_numbers = #tpu.dot_dimension_numbers<[1], [0], [0], [1], [0, 0, 1, 1], [], []>} : vector<8x32xbf16>, vector<32x128xbf16>, vector<8x128xf32> -> vector<8x128xf32>
    %c0_3 = arith.constant 0 : index
    %c0_4 = arith.constant 0 : index
    %4 = vector.load %arg3[%c0_3, %c0_4] : memref<1x128xf32, #tpu.memory_space<vmem>>, vector<1x128xf32>
    %5 = vector.broadcast %4 : vector<1x128xf32> to vector<8x128xf32>
    %6 = arith.addf %3, %5 : vector<8x128xf32>
    %cst_5 = arith.constant 0.000000e+00 : f32
    %7 = vector.broadcast %cst_5 : f32 to vector<8x128xf32>
    %8 = arith.cmpf oge, %6, %7 : vector<8x128xf32>
    %cst_6 = arith.constant 5.000000e-02 : f32
    %9 = vector.broadcast %cst_6 : f32 to vector<8x128xf32>
    %10 = arith.mulf %9, %6 : vector<8x128xf32>
    %11 = arith.select %8, %6, %10 : vector<8x128xi1>, vector<8x128xf32>
    %12 = arith.truncf %11 : vector<8x128xf32> to vector<8x128xbf16>
    %c0_7 = arith.constant 0 : index
    %c0_8 = arith.constant 0 : index
    %13 = vector.load %arg4[%c0_7, %c0_8] : memref<128x128xbf16, #tpu.memory_space<vmem>>, vector<128x128xbf16>
    %cst_9 = arith.constant dense<0.000000e+00> : vector<8x128xf32>
    %14 = tpu.matmul %12, %13, %cst_9 {dimension_numbers = #tpu.dot_dimension_numbers<[1], [0], [0], [1], [0, 0, 1, 1], [], []>} : vector<8x128xbf16>, vector<128x128xbf16>, vector<8x128xf32> -> vector<8x128xf32>
    %c0_10 = arith.constant 0 : index
    %c0_11 = arith.constant 0 : index
    %15 = vector.load %arg5[%c0_10, %c0_11] : memref<1x128xf32, #tpu.memory_space<vmem>>, vector<1x128xf32>
    %16 = vector.broadcast %15 : vector<1x128xf32> to vector<8x128xf32>
    %17 = arith.addf %14, %16 : vector<8x128xf32>
    %cst_12 = arith.constant 0.000000e+00 : f32
    %18 = vector.broadcast %cst_12 : f32 to vector<8x128xf32>
    %19 = arith.cmpf oge, %17, %18 : vector<8x128xf32>
    %cst_13 = arith.constant 5.000000e-02 : f32
    %20 = vector.broadcast %cst_13 : f32 to vector<8x128xf32>
    %21 = arith.mulf %20, %17 : vector<8x128xf32>
    %22 = arith.select %19, %17, %21 : vector<8x128xi1>, vector<8x128xf32>
    %23 = arith.truncf %22 : vector<8x128xf32> to vector<8x128xbf16>
    %c0_14 = arith.constant 0 : index
    %c0_15 = arith.constant 0 : index
    %24 = vector.load %arg6[%c0_14, %c0_15] : memref<128x128xbf16, #tpu.memory_space<vmem>>, vector<128x128xbf16>
    %cst_16 = arith.constant dense<0.000000e+00> : vector<8x128xf32>
    %25 = tpu.matmul %23, %24, %cst_16 {dimension_numbers = #tpu.dot_dimension_numbers<[1], [0], [0], [1], [0, 0, 1, 1], [], []>} : vector<8x128xbf16>, vector<128x128xbf16>, vector<8x128xf32> -> vector<8x128xf32>
    %c0_17 = arith.constant 0 : index
    %c0_18 = arith.constant 0 : index
    %26 = vector.load %arg7[%c0_17, %c0_18] : memref<1x128xf32, #tpu.memory_space<vmem>>, vector<1x128xf32>
    %27 = vector.broadcast %26 : vector<1x128xf32> to vector<8x128xf32>
    %28 = arith.addf %25, %27 : vector<8x128xf32>
    %cst_19 = arith.constant 0.000000e+00 : f32
    %29 = vector.broadcast %cst_19 : f32 to vector<8x128xf32>
    %30 = arith.cmpf oge, %28, %29 : vector<8x128xf32>
    %cst_20 = arith.constant 5.000000e-02 : f32
    %31 = vector.broadcast %cst_20 : f32 to vector<8x128xf32>
    %32 = arith.mulf %31, %28 : vector<8x128xf32>
    %33 = arith.select %30, %28, %32 : vector<8x128xi1>, vector<8x128xf32>
    %34 = arith.truncf %33 : vector<8x128xf32> to vector<8x128xbf16>
    %c0_21 = arith.constant 0 : index
    %c0_22 = arith.constant 0 : index
    %35 = vector.load %arg8[%c0_21, %c0_22] : memref<128x128xbf16, #tpu.memory_space<vmem>>, vector<128x128xbf16>
    %cst_23 = arith.constant dense<0.000000e+00> : vector<8x128xf32>
    %36 = tpu.matmul %34, %35, %cst_23 {dimension_numbers = #tpu.dot_dimension_numbers<[1], [0], [0], [1], [0, 0, 1, 1], [], []>} : vector<8x128xbf16>, vector<128x128xbf16>, vector<8x128xf32> -> vector<8x128xf32>
    %c0_24 = arith.constant 0 : index
    %c0_25 = arith.constant 0 : index
    %37 = vector.load %arg9[%c0_24, %c0_25] : memref<1x128xf32, #tpu.memory_space<vmem>>, vector<1x128xf32>
    %38 = vector.broadcast %37 : vector<1x128xf32> to vector<8x128xf32>
    %39 = arith.addf %36, %38 : vector<8x128xf32>
    %cst_26 = arith.constant 0.000000e+00 : f32
    %40 = vector.broadcast %cst_26 : f32 to vector<8x128xf32>
    %41 = arith.cmpf oge, %39, %40 : vector<8x128xf32>
    %cst_27 = arith.constant 5.000000e-02 : f32
    %42 = vector.broadcast %cst_27 : f32 to vector<8x128xf32>
    %43 = arith.mulf %42, %39 : vector<8x128xf32>
    %44 = arith.select %41, %39, %43 : vector<8x128xi1>, vector<8x128xf32>
    %45 = arith.truncf %44 : vector<8x128xf32> to vector<8x128xbf16>
    %c0_28 = arith.constant 0 : index
    %c0_29 = arith.constant 0 : index
    %46 = vector.load %arg10[%c0_28, %c0_29] : memref<128x1152xbf16, #tpu.memory_space<vmem>>, vector<128x1152xbf16>
    %cst_30 = arith.constant dense<0.000000e+00> : vector<8x1152xf32>
    %47 = tpu.matmul %45, %46, %cst_30 {dimension_numbers = #tpu.dot_dimension_numbers<[1], [0], [0], [1], [0, 0, 1, 1], [], []>} : vector<8x128xbf16>, vector<128x1152xbf16>, vector<8x1152xf32> -> vector<8x1152xf32>
    %c0_31 = arith.constant 0 : index
    %c0_32 = arith.constant 0 : index
    %48 = vector.load %arg11[%c0_31, %c0_32] : memref<1x1152xf32, #tpu.memory_space<vmem>>, vector<1x1152xf32>
    %49 = vector.broadcast %48 : vector<1x1152xf32> to vector<8x1152xf32>
    %50 = arith.addf %47, %49 : vector<8x1152xf32>
    %51 = vector.extract_strided_slice %50 {offsets = [0, 0], sizes = [8, 128], strides = [1, 1]} : vector<8x1152xf32> to vector<8x128xf32>
    %c0_33 = arith.constant 0 : index
    %c0_34 = arith.constant 0 : index
    %52 = vector.load %arg12[%c0_33, %c0_34] : memref<8x640xf32, #tpu.memory_space<vmem>>, vector<8x128xf32>
    tpu.vector_store %arg12[%c0_33, %c0_34], %51 {strides = array<i32>} : memref<8x640xf32, #tpu.memory_space<vmem>>, vector<8x128xf32>,
    %53 = vector.extract_strided_slice %50 {offsets = [0, 128], sizes = [8, 256], strides = [1, 1]} : vector<8x1152xf32> to vector<8x256xf32>
    %cst_35 = arith.constant 0.000000e+00 : f32
    %54 = vector.broadcast %cst_35 : f32 to vector<8x256xf32>
    %55 = arith.cmpf oge, %53, %54 : vector<8x256xf32>
    %cst_36 = arith.constant 5.000000e-02 : f32
    %56 = vector.broadcast %cst_36 : f32 to vector<8x256xf32>
    %57 = arith.mulf %56, %53 : vector<8x256xf32>
    %58 = arith.select %55, %53, %57 : vector<8x256xi1>, vector<8x256xf32>
    %59 = vector.extract_strided_slice %50 {offsets = [0, 384], sizes = [8, 256], strides = [1, 1]} : vector<8x1152xf32> to vector<8x256xf32>
    %cst_37 = arith.constant 0.000000e+00 : f32
    %60 = vector.broadcast %cst_37 : f32 to vector<8x256xf32>
    %61 = arith.cmpf oge, %59, %60 : vector<8x256xf32>
    %cst_38 = arith.constant 5.000000e-02 : f32
    %62 = vector.broadcast %cst_38 : f32 to vector<8x256xf32>
    %63 = arith.mulf %62, %59 : vector<8x256xf32>
    %64 = arith.select %61, %59, %63 : vector<8x256xi1>, vector<8x256xf32>
    %65 = arith.addf %58, %64 : vector<8x256xf32>
    %66 = vector.extract_strided_slice %50 {offsets = [0, 640], sizes = [8, 256], strides = [1, 1]} : vector<8x1152xf32> to vector<8x256xf32>
    %cst_39 = arith.constant 0.000000e+00 : f32
    %67 = vector.broadcast %cst_39 : f32 to vector<8x256xf32>
    %68 = arith.cmpf oge, %66, %67 : vector<8x256xf32>
    %cst_40 = arith.constant 5.000000e-02 : f32
    %69 = vector.broadcast %cst_40 : f32 to vector<8x256xf32>
    %70 = arith.mulf %69, %66 : vector<8x256xf32>
    %71 = arith.select %68, %66, %70 : vector<8x256xi1>, vector<8x256xf32>
    %72 = vector.extract_strided_slice %50 {offsets = [0, 896], sizes = [8, 256], strides = [1, 1]} : vector<8x1152xf32> to vector<8x256xf32>
    %cst_41 = arith.constant 0.000000e+00 : f32
    %73 = vector.broadcast %cst_41 : f32 to vector<8x256xf32>
    %74 = arith.cmpf oge, %72, %73 : vector<8x256xf32>
    %cst_42 = arith.constant 5.000000e-02 : f32
    %75 = vector.broadcast %cst_42 : f32 to vector<8x256xf32>
    %76 = arith.mulf %75, %72 : vector<8x256xf32>
    %77 = arith.select %74, %72, %76 : vector<8x256xi1>, vector<8x256xf32>
    %78 = arith.addf %71, %77 : vector<8x256xf32>
    %79 = arith.subf %65, %78 : vector<8x256xf32>
    %80 = arith.negf %79 : vector<8x256xf32>
    %81 = math.exp %80 : vector<8x256xf32>
    %cst_43 = arith.constant 1.000000e+00 : f32
    %82 = vector.broadcast %cst_43 : f32 to vector<8x256xf32>
    %83 = arith.addf %82, %81 : vector<8x256xf32>
    %84 = arith.divf %82, %83 : vector<8x256xf32>
    %cst_44 = arith.constant 1.000000e+00 : f32
    %85 = vector.broadcast %cst_44 : f32 to vector<8x256xf32>
    %86 = arith.subf %85, %84 : vector<8x256xf32>
    %c0_45 = arith.constant 0 : index
    %c128 = arith.constant 128 : index
    %87 = vector.load %arg12[%c0_45, %c128] : memref<8x640xf32, #tpu.memory_space<vmem>>, vector<8x256xf32>
    tpu.vector_store %arg12[%c0_45, %c128], %84 {strides = array<i32>} : memref<8x640xf32, #tpu.memory_space<vmem>>, vector<8x256xf32>,
    %c0_46 = arith.constant 0 : index
    %c384 = arith.constant 384 : index
    %88 = vector.load %arg12[%c0_46, %c384] : memref<8x640xf32, #tpu.memory_space<vmem>>, vector<8x256xf32>
    tpu.vector_store %arg12[%c0_46, %c384], %86 {strides = array<i32>} : memref<8x640xf32, #tpu.memory_space<vmem>>, vector<8x256xf32>,
    return
  }
  func.func @transform_0(%arg0: i32) -> (i32, i32) {
    %c0_i32 = arith.constant 0 : i32
    %c0_i32_0 = arith.constant 0 : i32
    return %arg0, %c0_i32 : i32, i32
  }
  func.func @transform_1(%arg0: i32) -> (i32, i32) {
    %c0_i32 = arith.constant 0 : i32
    %c0_i32_0 = arith.constant 0 : i32
    %c0_i32_1 = arith.constant 0 : i32
    return %c0_i32, %c0_i32_0 : i32, i32
  }
  func.func @transform_2(%arg0: i32) -> (i32, i32) {
    %c0_i32 = arith.constant 0 : i32
    %c0_i32_0 = arith.constant 0 : i32
    %c0_i32_1 = arith.constant 0 : i32
    return %c0_i32, %c0_i32_0 : i32, i32
  }
  func.func @transform_3(%arg0: i32) -> (i32, i32) {
    %c0_i32 = arith.constant 0 : i32
    %c0_i32_0 = arith.constant 0 : i32
    %c0_i32_1 = arith.constant 0 : i32
    return %c0_i32, %c0_i32_0 : i32, i32
  }
  func.func @transform_4(%arg0: i32) -> (i32, i32) {
    %c0_i32 = arith.constant 0 : i32
    %c0_i32_0 = arith.constant 0 : i32
    %c0_i32_1 = arith.constant 0 : i32
    return %c0_i32, %c0_i32_0 : i32, i32
  }
  func.func @transform_5(%arg0: i32) -> (i32, i32) {
    %c0_i32 = arith.constant 0 : i32
    %c0_i32_0 = arith.constant 0 : i32
    %c0_i32_1 = arith.constant 0 : i32
    return %c0_i32, %c0_i32_0 : i32, i32
  }
  func.func @transform_6(%arg0: i32) -> (i32, i32) {
    %c0_i32 = arith.constant 0 : i32
    %c0_i32_0 = arith.constant 0 : i32
    %c0_i32_1 = arith.constant 0 : i32
    return %c0_i32, %c0_i32_0 : i32, i32
  }
  func.func @transform_7(%arg0: i32) -> (i32, i32) {
    %c0_i32 = arith.constant 0 : i32
    %c0_i32_0 = arith.constant 0 : i32
    %c0_i32_1 = arith.constant 0 : i32
    return %c0_i32, %c0_i32_0 : i32, i32
  }
  func.func @transform_8(%arg0: i32) -> (i32, i32) {
    %c0_i32 = arith.constant 0 : i32
    %c0_i32_0 = arith.constant 0 : i32
    %c0_i32_1 = arith.constant 0 : i32
    return %c0_i32, %c0_i32_0 : i32, i32
  }
  func.func @transform_9(%arg0: i32) -> (i32, i32) {
    %c0_i32 = arith.constant 0 : i32
    %c0_i32_0 = arith.constant 0 : i32
    %c0_i32_1 = arith.constant 0 : i32
    return %c0_i32, %c0_i32_0 : i32, i32
  }
  func.func @transform_10(%arg0: i32) -> (i32, i32) {
    %c0_i32 = arith.constant 0 : i32
    %c0_i32_0 = arith.constant 0 : i32
    %c0_i32_1 = arith.constant 0 : i32
    return %c0_i32, %c0_i32_0 : i32, i32
  }
  func.func @transform_11(%arg0: i32) -> (i32, i32) {
    %c0_i32 = arith.constant 0 : i32
    %c0_i32_0 = arith.constant 0 : i32
    return %arg0, %c0_i32 : i32, i32
  }
}

</mosaic_0001>

<bundles_post_ra>
// kernel: rgadj_forward_node_edge.1
= control target key start
LH: loop header
LB: loop body
LE: loop exit
PB: predicated region body
PF: predicated region fallthrough
CT: control target
= control target key end

     0   :  { %16 = vsyncpa [#allocation3], 0  ;;  %s2024_s0 = inlined_call_operand.hbm [shape: f32[8,32], index: 0, kind: input, shape index: {}]   ;;  %s2025_s1 = inlined_call_operand.hbm [shape: bf16[32,128], index: 1, kind: input, shape index: {}]   ;;  %s2026_s2 = inlined_call_operand.vmem [shape: f32[1,128], index: 2, kind: input, shape index: {}]   ;;  %s2027_s3 = inlined_call_operand.hbm [shape: bf16[128,128], index: 3, kind: input, shape index: {}]   ;;  %s2028_s4 = inlined_call_operand.vmem [shape: f32[1,128], index: 4, kind: input, shape index: {}]   ;;  %s2029_s5 = inlined_call_operand.hbm [shape: bf16[128,128], index: 5, kind: input, shape index: {}]   ;;  %s2030_s6 = inlined_call_operand.vmem [shape: f32[1,128], index: 6, kind: input, shape index: {}]   ;;  %s2031_s7 = inlined_call_operand.hbm [shape: bf16[128,128], index: 7, kind: input, shape index: {}]   ;;  %s2032_s8 = inlined_call_operand.vmem [shape: f32[1,128], index: 8, kind: input, shape index: {}]   ;;  %s2033_s9 = inlined_call_operand.hbm [shape: bf16[128,1152], index: 9, kind: input, shape index: {}]   ;;  %s2034_s10 = inlined_call_operand.hbm [shape: f32[1,1152], index: 10, kind: input, shape index: {}]   ;;  %s2035_s11 = inlined_call_operand.vmem [shape: f32[8,640], index: 11, kind: output, shape index: {}]  }
   0x1   :  { %17 = vsyncpa [#allocation5], 0 }
   0x2   :  { %18 = vsyncpa [#allocation8], 0 }
   0x3   :  { %19 = vsyncpa [#allocation11], 0  ;;  %s1839_s17 = smov [#allocation4]  }
   0x4   :  { %s35_s18 = sshll.u32 %s1839_s17, 4  ;;  %s36_s18 = int_to_ptr.vmem [resolvable:$true] %s35_s18 }
   0x5   :  { %s1699_s19 = scalar_lea.vmem %s36_s18, 256  ;;  %p1704_p1 = scmp.lt.s32.totalorder %s36_s18, %s36_s18 }
   0x6   :  { %p1700_p0 = scmp.ne.s32.totalorder %s36_s18, %s1699_s19  ;;  %p1705_p2 = scmp.lt.s32.totalorder %s1699_s19, %s1699_s19 }
   0x8   :  { %p1706_p3 = por %p1705_p2, %p1704_p1 }
   0xa   :  { %p1707_p4 = pnand %p1706_p3, %p1700_p0 }
   0xc   :  { %1710 = shalt.err (!%p1707_p4)
}
   0xd   :  { %s1840_s20 = smov 64   ;;  %s1841_s21 = smov 4  }
   0xe   :  { %41 = dma.hbm_to_vmem [thread:$0]  %s2025_s1, 256, %s36_s18, [#allocation5], %s1840_s20, %s1840_s20, %s1841_s21  }
   0xf   :  { %s1842_s24 = smov [#allocation7]   ;;  %s1843_s26 = smov [#allocation10]  }
  0x10   :  { %s63_s25 = sshll.u32 %s1842_s24, 4  ;;  %s91_s27 = sshll.u32 %s1843_s26, 4  ;;  %s64_s25 = int_to_ptr.vmem [resolvable:$true] %s63_s25  ;;  %s92_s27 = int_to_ptr.vmem [resolvable:$true] %s91_s27 }
  0x11   :  { %s1719_s28 = scalar_lea.vmem %s64_s25, 1024  ;;  %p1724_p6 = scmp.lt.s32.totalorder %s64_s25, %s64_s25 }
  0x12   :  { %p1720_p5 = scmp.ne.s32.totalorder %s64_s25, %s1719_s28  ;;  %p1725_p7 = scmp.lt.s32.totalorder %s1719_s28, %s1719_s28 }
  0x14   :  { %p1726_p8 = por %p1725_p7, %p1724_p6 }
  0x16   :  { %p1727_p9 = pnand %p1726_p8, %p1720_p5 }
  0x18   :  { %1730 = shalt.err (!%p1727_p9)
}
  0x19   :  { %69 = dma.hbm_to_vmem [thread:$0]  %s2029_s5, 1024, %s64_s25, [#allocation8], %s1840_s20, %s1840_s20, %s1841_s21  }
  0x1a   :  { %s1739_s1 = scalar_lea.vmem %s92_s27, 9216  ;;  %p1744_p11 = scmp.lt.s32.totalorder %s92_s27, %s92_s27 }
  0x1b   :  { %p1740_p10 = scmp.ne.s32.totalorder %s92_s27, %s1739_s1  ;;  %p1745_p12 = scmp.lt.s32.totalorder %s1739_s1, %s1739_s1 }
  0x1d   :  { %p1746_p13 = por %p1745_p12, %p1744_p11 }
  0x1f   :  { %p1747_p0 = pnand %p1746_p13, %p1740_p10 }
  0x21   :  { %1750 = shalt.err (!%p1747_p0)
}
  0x22   :  { %s1844_s12 = smov 576   ;;  %s1845_s13 = smov 36  }
  0x23   :  { %97 = dma.hbm_to_vmem [thread:$0]  %s2033_s9, 9216, %s92_s27, [#allocation11], %s1844_s12, %s1844_s12, %s1845_s13  }
  0x24   :  { %s1846_s16 = smov [#allocation2]   ;;  %s1847_s18 = smov [#allocation6]  }
  0x25   :  { %s26_s17 = sshll.u32 %s1846_s16, 4  ;;  %s49_s19 = sshll.u32 %s1847_s18, 4  ;;  %s27_s17 = int_to_ptr.vmem [resolvable:$true] %s26_s17  ;;  %s50_s19 = int_to_ptr.vmem [resolvable:$true] %s49_s19 }
  0x26   :  { %s1759_s5 = scalar_lea.vmem %s27_s17, 128  ;;  %p1764_p2 = scmp.lt.s32.totalorder %s27_s17, %s27_s17 }
  0x27   :  { %p1760_p1 = scmp.ne.s32.totalorder %s27_s17, %s1759_s5  ;;  %p1765_p3 = scmp.lt.s32.totalorder %s1759_s5, %s1759_s5 }
  0x29   :  { %p1766_p4 = por %p1765_p3, %p1764_p2 }
  0x2b   :  { %p1767_p5 = pnand %p1766_p4, %p1760_p1 }
  0x2d   :  { %1770 = shalt.err (!%p1767_p5)
}
  0x2e   :  { %29 = dma.hbm_to_vmem [thread:$0]  %s2024_s0, 128, %s27_s17, [#allocation3]  }
  0x2f   :  { %s1779_s24 = scalar_lea.vmem %s50_s19, 1024  ;;  %p1784_p7 = scmp.lt.s32.totalorder %s50_s19, %s50_s19 }
  0x30   :  { %p1780_p6 = scmp.ne.s32.totalorder %s50_s19, %s1779_s24  ;;  %p1785_p8 = scmp.lt.s32.totalorder %s1779_s24, %s1779_s24 }
  0x32   :  { %p1786_p9 = por %p1785_p8, %p1784_p7 }
  0x34   :  { %p1787_p10 = pnand %p1786_p9, %p1780_p6 }
  0x36   :  { %1790 = shalt.err (!%p1787_p10)
}
  0x37   :  { %55 = dma.hbm_to_vmem [thread:$0]  %s2027_s3, 1024, %s50_s19, [#allocation5], %s1840_s20, %s1840_s20, %s1841_s21  }
  0x38   :  { %s1848_s26 = smov [#allocation9]   ;;  %s1849_s28 = smov [#allocation12]  }
  0x39   :  { %s77_s27 = sshll.u32 %s1848_s26, 4  ;;  %s104_s0 = sshll.u32 %s1849_s28, 4  ;;  %s78_s27 = int_to_ptr.vmem [resolvable:$true] %s77_s27  ;;  %s105_s0 = int_to_ptr.vmem [resolvable:$true] %s104_s0 }
  0x3a   :  { %s1799_s29 = scalar_lea.vmem %s78_s27, 1024  ;;  %p1804_p12 = scmp.lt.s32.totalorder %s78_s27, %s78_s27 }
  0x3b   :  { %p1800_p11 = scmp.ne.s32.totalorder %s78_s27, %s1799_s29  ;;  %p1805_p13 = scmp.lt.s32.totalorder %s1799_s29, %s1799_s29 }
  0x3d   :  { %p1806_p0 = por %p1805_p13, %p1804_p12 }
  0x3f   :  { %p1807_p1 = pnand %p1806_p0, %p1800_p11 }
  0x41   :  { %1810 = shalt.err (!%p1807_p1)
}
  0x42   :  { %83 = dma.hbm_to_vmem [thread:$0]  %s2031_s7, 1024, %s78_s27, [#allocation8], %s1840_s20, %s1840_s20, %s1841_s21  }
  0x43   :  { %s1819_s3 = scalar_lea.vmem %s105_s0, 144  ;;  %s1823_s12 = scalar_lea.vmem %s105_s0, 160 }
  0x44   :  { %p1820_p2 = scmp.ne.s32.totalorder %s105_s0, %s1819_s3  ;;  %p1824_p3 = scmp.lt.s32.totalorder %s105_s0, %s105_s0 }
  0x45   :  { %p1825_p4 = scmp.lt.s32.totalorder %s1823_s12, %s1819_s3 }
  0x47   :  { %p1826_p5 = por %p1825_p4, %p1824_p3 }
  0x49   :  { %p1827_p6 = pnand %p1826_p5, %p1820_p2 }
  0x4b   :  { %1830 = shalt.err (!%p1827_p6)
}
  0x4c   :  { %107 = dma.hbm_to_vmem [thread:$0]  %s2034_s10, 144, %s105_s0, [#allocation11]  }
  0x4d   :  { %1831 = dma.done.wait [#allocation3], 128  }
  0x4e   :  { %1832 = vsyncadd [#allocation3], 4294967168 }
  0x4f   :  { %1833 = dma.done.wait [#allocation5], 1280  }
  0x50   :  { %1834 = vsyncadd [#allocation5], 4294966016 }
  0x51   :  { %1835 = dma.done.wait [#allocation8], 2048  }
  0x52   :  { %1836 = vsyncadd [#allocation8], 4294965248 }
  0x53   :  { %1837 = dma.done.wait [#allocation11], 9360  }
  0x54   :  { %1838 = vsyncadd [#allocation11], 4294957936  ;;  %v1850_v0 = vmov 0.0   ;;  %vm1851_vm0 = vmmov 0   ;;  %v1553_v1 = vld [vmem:[#allocation4 + $0x8] sm:$0xff]   ;;  %v1554_v2 = vld [vmem:[#allocation4] sm:$0xff]  }
  0x55   :  { %1451 = vmatprep.subr.bf16.mxu0 %v1850_v0  ;;  %1455 = vmatprep.mubr.msk.bf16.mxu0 %vm1851_vm0, %v1850_v0  ;;  %v130_v3 = vld [vmem:[#allocation2] sm:$0xff]  ;;  %v1555_v4 = vld [vmem:[#allocation6 + $0x38] sm:$0xff]   ;;  %v1556_v6 = vld [vmem:[#allocation6 + $0x30] sm:$0xff]   ;;  %vm155_vm1 = vcmask 261120  }
  0x56   :  { %1459 = vmatprep.subr.bf16.mxu1 %v1850_v0  ;;  %1475 = vmatprep.mubr.msk.bf16.mxu1 %vm1851_vm0, %v1850_v0  ;;  %v131_v5 = vpack.c.bf16 %v130_v3, %v130_v3  ;;  %v1557_v7 = vld [vmem:[#allocation6 + $0x28] sm:$0xff]   ;;  %v1558_v8 = vld [vmem:[#allocation6 + $0x20] sm:$0xff]   ;;  %v1559_v9 = vld [vmem:[#allocation6 + $0x18] sm:$0xff]  }
  0x57   :  { %1452 = vmatpush3.bf16.msra.mxu0 %v1553_v1  ;;  %1460 = vmatpush3.bf16.msra.mxu1 %v1555_v4  ;;  %v1560_v10 = vld [vmem:[#allocation6 + $0x10] sm:$0xff]   ;;  %v1561_v11 = vld [vmem:[#allocation6 + $0x8] sm:$0xff]   ;;  %v1562_v12 = vld [vmem:[#allocation6] sm:$0xff]  }
  0x58   :  { %1453 = vmatprep.subr.bf16.mxu0 %v1850_v0  ;;  %1461 = vmatprep.subr.bf16.mxu1 %v1850_v0  ;;  %v1563_v13 = vld [vmem:[#allocation7 + $0x38] sm:$0xff]   ;;  %v1564_v14 = vld [vmem:[#allocation7 + $0x30] sm:$0xff]   ;;  %v1565_v15 = vld [vmem:[#allocation7 + $0x28] sm:$0xff]  }
  0x59   :  { %v1566_v16 = vld [vmem:[#allocation7 + $0x20] sm:$0xff]   ;;  %v1567_v17 = vld [vmem:[#allocation7 + $0x18] sm:$0xff]   ;;  %v1568_v18 = vld [vmem:[#allocation7 + $0x10] sm:$0xff]  }
  0x5a   :  { %v1306_v19 = vld [vmem:[%s2026_s2] ss:$0 sm:$0xff]  ;;  %v1570_v29 = vld [vmem:[#allocation7] sm:$0xff]   ;;  %v1571_v30 = vld [vmem:[#allocation9 + $0x38] sm:$0xff]  }
  0x5b   :  { %1454 = vmatpush3.bf16.msra.mxu0 %v1554_v2  ;;  %1462 = vmatpush3.bf16.msra.mxu1 %v1556_v6  ;;  %v1569_v28 = vld [vmem:[#allocation7 + $0x8] sm:$0xff]   ;;  %v1572_v31 = vld [vmem:[#allocation9 + $0x30] sm:$0xff]   ;;  %v1574_v33 = vld [vmem:[#allocation9 + $0x20] sm:$0xff]  }
  0x5c   :  { %1479 = vmatprep.subr.bf16.mxu0 %v1850_v0  ;;  %1463 = vmatprep.subr.bf16.mxu1 %v1850_v0  ;;  %v1573_v32 = vld [vmem:[#allocation9 + $0x28] sm:$0xff]   ;;  %v1575_v34 = vld [vmem:[#allocation9 + $0x18] sm:$0xff]   ;;  %v1576_v35 = vld [vmem:[#allocation9 + $0x10] sm:$0xff]  }
  0x5d   :  { %v1310_v36 = vld [vmem:[%s2028_s4] ss:$0 sm:$0xff]  ;;  %v1578_v46 = vld [vmem:[#allocation9] sm:$0xff]   ;;  %v1579_v47 = vld [vmem:[#allocation10 + $0x1f8] ss:$36 sps:$4 sm:$0xff]  }
  0x5e   :  { %1456 = vmatmul.mubr.msk.bf16.vlgmr.msra.gmra.mxu0 %vm155_vm1, %v131_v5  ;;  %v1577_v45 = vld [vmem:[#allocation9 + $0x8] sm:$0xff]   ;;  %v1581_v48 = vld [vmem:[#allocation10 + $0x1fc] ss:$36 sps:$4 sm:$0xff]   ;;  %v1587_v50 = vld [vmem:[#allocation10 + $0x1b4] ss:$36 sps:$4 sm:$0xff]  }
  0x5f   :  { %1495 = vmatprep.mubr.msk.bf16.mxu0 %vm1851_vm0, %v1850_v0  ;;  %1464 = vmatpush3.bf16.msra.mxu1 %v1557_v7  ;;  %v1584_v49 = vld [vmem:[#allocation10 + $0x204] ss:$36 sps:$4 sm:$0xff]   ;;  %v1585_v51 = vld [vmem:[#allocation10 + $0x1b0] ss:$36 sps:$4 sm:$0xff]   ;;  %v1605_v56 = vld [vmem:[#allocation10 + $0xdc] ss:$36 sps:$4 sm:$0xff]  }
  0x60   :  { %1465 = vmatprep.subr.bf16.mxu1 %v1850_v0  ;;  %1480 = vmatpush3.bf16.msra.mxu0 %v1563_v13  ;;  %v1593_v52 = vld [vmem:[#allocation10 + $0x16c] ss:$36 sps:$4 sm:$0xff]   ;;  %v1599_v54 = vld [vmem:[#allocation10 + $0x124] ss:$36 sps:$4 sm:$0xff]   ;;  %v1603_v57 = vld [vmem:[#allocation10 + $0xd8] ss:$36 sps:$4 sm:$0xff]  }
  0x61   :  { %1481 = vmatprep.subr.bf16.mxu0 %v1850_v0  ;;  %v1591_v53 = vld [vmem:[#allocation10 + $0x168] ss:$36 sps:$4 sm:$0xff]   ;;  %v1597_v55 = vld [vmem:[#allocation10 + $0x120] ss:$36 sps:$4 sm:$0xff]   ;;  %v1611_v58 = vld [vmem:[#allocation10 + $0x94] ss:$36 sps:$4 sm:$0xff]  }
  0x62   :  { %v1609_v59 = vld [vmem:[#allocation10 + $0x90] ss:$36 sps:$4 sm:$0xff]   ;;  %v1615_v61 = vld [vmem:[#allocation10 + $0x48] ss:$36 sps:$4 sm:$0xff]   ;;  %v1582_v6 = vld [vmem:[#allocation10 + $0x200] ss:$36 sps:$4 sm:$0xff]  }
  0x63   :  { %1466 = vmatpush3.bf16.msra.mxu1 %v1558_v8  ;;  %v1617_v60 = vld [vmem:[#allocation10 + $0x4c] ss:$36 sps:$4 sm:$0xff]   ;;  %v1319_v62 = vld [vmem:[%s2030_s6] ss:$0 sm:$0xff] }
  0x64   :  { %1467 = vmatprep.subr.bf16.mxu1 %v1850_v0  ;;  %1482 = vmatpush3.bf16.msra.mxu0 %v1564_v14  ;;  %v1602_v13 = vld [vmem:[#allocation10 + $0x12c] ss:$36 sps:$4 sm:$0xff]  }
  0x65   :  { %1483 = vmatprep.subr.bf16.mxu0 %v1850_v0  ;;  %v1600_v14 = vld [vmem:[#allocation10 + $0x128] ss:$36 sps:$4 sm:$0xff]  }
  0x67   :  { %1468 = vmatpush3.bf16.msra.mxu1 %v1559_v9  ;;  %v1590_v9 = vld [vmem:[#allocation10 + $0x1bc] ss:$36 sps:$4 sm:$0xff]  }
  0x68   :  { %1469 = vmatprep.subr.bf16.mxu1 %v1850_v0  ;;  %1484 = vmatpush3.bf16.msra.mxu0 %v1565_v15  ;;  %v1608_v15 = vld [vmem:[#allocation10 + $0xe4] ss:$36 sps:$4 sm:$0xff]  }
  0x69   :  { %1485 = vmatprep.subr.bf16.mxu0 %v1850_v0 }
  0x6b   :  { %1470 = vmatpush3.bf16.msra.mxu1 %v1560_v10  ;;  %v1588_v10 = vld [vmem:[#allocation10 + $0x1b8] ss:$36 sps:$4 sm:$0xff]  }
  0x6c   :  { %1471 = vmatprep.subr.bf16.mxu1 %v1850_v0  ;;  %1486 = vmatpush3.bf16.msra.mxu0 %v1566_v16  ;;  %v1606_v16 = vld [vmem:[#allocation10 + $0xe0] ss:$36 sps:$4 sm:$0xff]  }
  0x6d   :  { %1487 = vmatprep.subr.bf16.mxu0 %v1850_v0 }
  0x6f   :  { %1472 = vmatpush3.bf16.msra.mxu1 %v1561_v11  ;;  %v1596_v11 = vld [vmem:[#allocation10 + $0x174] ss:$36 sps:$4 sm:$0xff]  }
  0x70   :  { %1473 = vmatprep.subr.bf16.mxu1 %v1850_v0  ;;  %1488 = vmatpush3.bf16.msra.mxu0 %v1567_v17  ;;  %v1614_v17 = vld [vmem:[#allocation10 + $0x9c] ss:$36 sps:$4 sm:$0xff]  }
  0x71   :  { %1489 = vmatprep.subr.bf16.mxu0 %v1850_v0 }
  0x73   :  { %1474 = vmatpush3.bf16.msra.mxu1 %v1562_v12  ;;  %v1594_v12 = vld [vmem:[#allocation10 + $0x170] ss:$36 sps:$4 sm:$0xff]  }
  0x74   :  { %1499 = vmatprep.subr.bf16.mxu1 %v1850_v0  ;;  %1490 = vmatpush3.bf16.msra.mxu0 %v1568_v18  ;;  %v1612_v18 = vld [vmem:[#allocation10 + $0x98] ss:$36 sps:$4 sm:$0xff]  }
  0x75   :  { %1491 = vmatprep.subr.bf16.mxu0 %v1850_v0 }
  0x78   :  { %1492 = vmatpush3.bf16.msra.mxu0 %v1569_v28  ;;  %v1328_v28 = vld [vmem:[%s2032_s8] ss:$0 sm:$0xff] }
  0x79   :  { %1493 = vmatprep.subr.bf16.mxu0 %v1850_v0 }
  0x7c   :  { %1494 = vmatpush3.bf16.msra.mxu0 %v1570_v29 }
  0x7d   :  { %1045 = vmatprep.subr.bf16.mxu0 %v1581_v48  ;;  %v1650_v48 = vld [vmem:[#allocation10 + $0x13c] ss:$36 sps:$4 sm:$0xff]  }
 0x11e   :  { %v193_v20 = vpop.f32.mrf.mxu0 }
 0x11f   :  { %v194_v21 = vadd.f32 %v1306_v19, %v193_v20  ;;  %v1620_v19 = vld [vmem:[#allocation10 + $0x54] ss:$36 sps:$4 sm:$0xff]  }
 0x120   :  { %v1457_v22 = vpop.f32.mrf.mxu0  ;;  %v1618_v20 = vld [vmem:[#allocation10 + $0x50] ss:$36 sps:$4 sm:$0xff]  }
 0x121   :  { %vm199_vm2 = vcmp.ge.f32.partialorder %v194_v21, 0.0  ;;  %v200_v23 = vmul.f32 0.05, %v194_v21  ;;  %v1626_v22 = vld [vmem:[#allocation10 + $0xc] ss:$36 sps:$4 sm:$0xff]  }
 0x122   :  { %v196_v24 = vpop.f32.mrf.mxu0 }
 0x123   :  { %v201_v25 = vsel %vm199_vm2, %v194_v21, %v200_v23  ;;  %v1623_v21 = vld [vmem:[#allocation10 + $0x4] ss:$36 sps:$4 sm:$0xff]  }
 0x124   :  { %v1458_v26 = vpop.f32.mrf.mxu0  ;;  %v202_v27 = vpack.c.bf16 %v201_v25, %v201_v25  ;;  %v1621_v23 = vld [vmem:[#allocation10] ss:$36 sps:$4 sm:$0xff]   ;;  %v1624_v24 = vld [vmem:[#allocation10 + $0x8] ss:$36 sps:$4 sm:$0xff]  }
 0x125   :  { %v1629_v25 = vld [vmem:[#allocation10 + $0x20c] ss:$36 sps:$4 sm:$0xff]   ;;  %v1632_v26 = vld [vmem:[#allocation10 + $0x214] ss:$36 sps:$4 sm:$0xff]  }
 0x126   :  { %1476 = vmatmul.mubr.bf16.vlgmr.msra.gmra.mxu1 %v202_v27  ;;  %v1852_v27 = vmov 0  }
 0x127   :  { %1515 = vmatprep.mubr.msk.bf16.mxu1 %vm1851_vm0, %v1850_v0  ;;  %1500 = vmatpush3.bf16.msra.mxu1 %v1571_v30 }
 0x128   :  { %1501 = vmatprep.subr.bf16.mxu1 %v1850_v0 }
 0x12b   :  { %1502 = vmatpush3.bf16.msra.mxu1 %v1572_v31 }
 0x12c   :  { %1503 = vmatprep.subr.bf16.mxu1 %v1850_v0 }
 0x12f   :  { %1504 = vmatpush3.bf16.msra.mxu1 %v1573_v32 }
 0x130   :  { %1505 = vmatprep.subr.bf16.mxu1 %v1850_v0 }
 0x133   :  { %1506 = vmatpush3.bf16.msra.mxu1 %v1574_v33 }
 0x134   :  { %1507 = vmatprep.subr.bf16.mxu1 %v1850_v0 }
 0x137   :  { %1508 = vmatpush3.bf16.msra.mxu1 %v1575_v34 }
 0x138   :  { %1509 = vmatprep.subr.bf16.mxu1 %v1850_v0 }
 0x13b   :  { %1510 = vmatpush3.bf16.msra.mxu1 %v1576_v35  ;;  %v1627_v35 = vld [vmem:[#allocation10 + $0x208] ss:$36 sps:$4 sm:$0xff]  }
 0x13c   :  { %1511 = vmatprep.subr.bf16.mxu1 %v1850_v0 }
 0x13f   :  { %1512 = vmatpush3.bf16.msra.mxu1 %v1577_v45  ;;  %v1639_v45 = vld [vmem:[#allocation10 + $0x178] ss:$36 sps:$4 sm:$0xff]  }
 0x140   :  { %1513 = vmatprep.subr.bf16.mxu1 %v1850_v0 }
 0x143   :  { %1514 = vmatpush3.bf16.msra.mxu1 %v1578_v46  ;;  %v1642_v46 = vld [vmem:[#allocation10 + $0x180] ss:$36 sps:$4 sm:$0xff]  }
 0x144   :  { %1086 = vmatprep.subr.bf16.mxu1 %v1584_v49  ;;  %v1645_v49 = vld [vmem:[#allocation10 + $0x130] ss:$36 sps:$4 sm:$0xff]  }
 0x1e6   :  { %v308_v37 = vpop.f32.mrf.mxu1 }
 0x1e7   :  { %v309_v38 = vadd.f32 %v1310_v36, %v308_v37  ;;  %v1630_v36 = vld [vmem:[#allocation10 + $0x210] ss:$36 sps:$4 sm:$0xff]  }
 0x1e8   :  { %v1477_v39 = vpop.f32.mrf.mxu1 }
 0x1e9   :  { %vm314_vm3 = vcmp.ge.f32.partialorder %v309_v38, 0.0  ;;  %v315_v40 = vmul.f32 0.05, %v309_v38  ;;  %v1635_v39 = vld [vmem:[#allocation10 + $0x1c4] ss:$36 sps:$4 sm:$0xff]  }
 0x1ea   :  { %v311_v41 = vpop.f32.mrf.mxu1 }
 0x1eb   :  { %v316_v42 = vsel %vm314_vm3, %v309_v38, %v315_v40  ;;  %v1638_v40 = vld [vmem:[#allocation10 + $0x1cc] ss:$36 sps:$4 sm:$0xff]   ;;  %v1633_v41 = vld [vmem:[#allocation10 + $0x1c0] ss:$36 sps:$4 sm:$0xff]  }
 0x1ec   :  { %v317_v43 = vpack.c.bf16 %v316_v42, %v316_v42  ;;  %v1478_v44 = vpop.f32.mrf.mxu1  ;;  %v1636_v42 = vld [vmem:[#allocation10 + $0x1c8] ss:$36 sps:$4 sm:$0xff]  }
 0x1ed   :  { %v1644_v44 = vld [vmem:[#allocation10 + $0x184] ss:$36 sps:$4 sm:$0xff]  }
 0x1ee   :  { %1496 = vmatmul.mubr.bf16.vlgmr.msra.gmra.mxu0 %v317_v43  ;;  %v1641_v43 = vld [vmem:[#allocation10 + $0x17c] ss:$36 sps:$4 sm:$0xff]  }
 0x1ef   :  { %1046 = vmatpush1.bf16.msra.mxu0 %v1579_v47  ;;  %1077 = vmatprep.mubr.bf16.mxu0 %v1852_v27  ;;  %v1647_v47 = vld [vmem:[#allocation10 + $0x134] ss:$36 sps:$4 sm:$0xff]  }
 0x1f0   :  { %1047 = vmatprep.subr.bf16.mxu0 %v1587_v50  ;;  %v1648_v50 = vld [vmem:[#allocation10 + $0x138] ss:$36 sps:$4 sm:$0xff]  }
 0x1f3   :  { %1048 = vmatpush1.bf16.msra.mxu0 %v1585_v51  ;;  %v1653_v51 = vld [vmem:[#allocation10 + $0xec] ss:$36 sps:$4 sm:$0xff]  }
 0x1f4   :  { %1049 = vmatprep.subr.bf16.mxu0 %v1593_v52  ;;  %v1656_v52 = vld [vmem:[#allocation10 + $0xf4] ss:$36 sps:$4 sm:$0xff]  }
 0x1f7   :  { %1050 = vmatpush1.bf16.msra.mxu0 %v1591_v53  ;;  %v1651_v53 = vld [vmem:[#allocation10 + $0xe8] ss:$36 sps:$4 sm:$0xff]  }
 0x1f8   :  { %1051 = vmatprep.subr.bf16.mxu0 %v1599_v54  ;;  %v1654_v54 = vld [vmem:[#allocation10 + $0xf0] ss:$36 sps:$4 sm:$0xff]  }
 0x1fb   :  { %1052 = vmatpush1.bf16.msra.mxu0 %v1597_v55  ;;  %v1659_v55 = vld [vmem:[#allocation10 + $0xa4] ss:$36 sps:$4 sm:$0xff]  }
 0x1fc   :  { %1053 = vmatprep.subr.bf16.mxu0 %v1605_v56  ;;  %v1662_v56 = vld [vmem:[#allocation10 + $0xac] ss:$36 sps:$4 sm:$0xff]  }
 0x1ff   :  { %1054 = vmatpush1.bf16.msra.mxu0 %v1603_v57  ;;  %v1657_v57 = vld [vmem:[#allocation10 + $0xa0] ss:$36 sps:$4 sm:$0xff]  }
 0x200   :  { %1055 = vmatprep.subr.bf16.mxu0 %v1611_v58  ;;  %v1660_v58 = vld [vmem:[#allocation10 + $0xa8] ss:$36 sps:$4 sm:$0xff]  }
 0x203   :  { %1056 = vmatpush1.bf16.msra.mxu0 %v1609_v59  ;;  %v1665_v59 = vld [vmem:[#allocation10 + $0x5c] ss:$36 sps:$4 sm:$0xff]  }
 0x204   :  { %1057 = vmatprep.subr.bf16.mxu0 %v1617_v60  ;;  %v1668_v60 = vld [vmem:[#allocation10 + $0x64] ss:$36 sps:$4 sm:$0xff]  }
 0x207   :  { %1058 = vmatpush1.bf16.msra.mxu0 %v1615_v61  ;;  %v1663_v61 = vld [vmem:[#allocation10 + $0x58] ss:$36 sps:$4 sm:$0xff]  }
 0x208   :  { %1059 = vmatprep.subr.bf16.mxu0 %v1623_v21 }
 0x20b   :  { %1060 = vmatpush1.bf16.msra.mxu0 %v1621_v23 }
 0x20c   :  { %1127 = vmatprep.subr.bf16.mxu0 %v1629_v25 }
 0x2ae   :  { %v423_v63 = vpop.f32.mrf.mxu0 }
 0x2af   :  { %v424_v1 = vadd.f32 %v1319_v62, %v423_v63  ;;  %v1666_v62 = vld [vmem:[#allocation10 + $0x60] ss:$36 sps:$4 sm:$0xff]   ;;  %v1671_v63 = vld [vmem:[#allocation10 + $0x14] ss:$36 sps:$4 sm:$0xff]  }
 0x2b0   :  { %v1497_v2 = vpop.f32.mrf.mxu0 }
 0x2b1   :  { %vm429_vm4 = vcmp.ge.f32.partialorder %v424_v1, 0.0  ;;  %v430_v3 = vmul.f32 0.05, %v424_v1  ;;  %v1669_v2 = vld [vmem:[#allocation10 + $0x10] ss:$36 sps:$4 sm:$0xff]  }
 0x2b2   :  { %v426_v4 = vpop.f32.mrf.mxu0 }
 0x2b3   :  { %v431_v5 = vsel %vm429_vm4, %v424_v1, %v430_v3  ;;  %v1674_v1 = vld [vmem:[#allocation10 + $0x1c] ss:$36 sps:$4 sm:$0xff]  }
 0x2b4   :  { %v432_v7 = vpack.c.bf16 %v431_v5, %v431_v5  ;;  %v1498_v8 = vpop.f32.mrf.mxu0  ;;  %v1672_v3 = vld [vmem:[#allocation10 + $0x18] ss:$36 sps:$4 sm:$0xff]   ;;  %v1676_v5 = vld [vmem:[#allocation10 + $0x1d0] ss:$36 sps:$4 sm:$0xff]  }
 0x2b5   :  { %v1675_v4 = vld [vmem:[#allocation10 + $0x218] ss:$36 sps:$4 sm:$0xff]  }
 0x2b6   :  { %1516 = vmatmul.mubr.bf16.vlgmr.msra.gmra.mxu1 %v432_v7  ;;  %v1678_v7 = vld [vmem:[#allocation10 + $0x140] ss:$36 sps:$4 sm:$0xff]   ;;  %v1679_v8 = vld [vmem:[#allocation10 + $0xf8] ss:$36 sps:$4 sm:$0xff]  }
 0x2b7   :  { %1087 = vmatpush1.bf16.msra.mxu1 %v1582_v6  ;;  %1118 = vmatprep.mubr.bf16.mxu1 %v1852_v27  ;;  %v1677_v6 = vld [vmem:[#allocation10 + $0x188] ss:$36 sps:$4 sm:$0xff]  }
 0x2b8   :  { %1088 = vmatprep.subr.bf16.mxu1 %v1590_v9  ;;  %v1680_v9 = vld [vmem:[#allocation10 + $0xb0] ss:$36 sps:$4 sm:$0xff]  }
 0x2bb   :  { %1089 = vmatpush1.bf16.msra.mxu1 %v1588_v10  ;;  %v1681_v10 = vld [vmem:[#allocation10 + $0x68] ss:$36 sps:$4 sm:$0xff]  }
 0x2bc   :  { %1090 = vmatprep.subr.bf16.mxu1 %v1596_v11  ;;  %v632_v11 = vlaneseq }
 0x2bf   :  { %1091 = vmatpush1.bf16.msra.mxu1 %v1594_v12  ;;  %v1682_v12 = vld [vmem:[#allocation10 + $0x20] ss:$36 sps:$4 sm:$0xff]  }
 0x2c0   :  { %1092 = vmatprep.subr.bf16.mxu1 %v1602_v13  ;;  %v633_v13 = vshrl.u32 %v632_v11, 7 }
 0x2c2   :  { %v634_v21 = vsub.s32 0, %v633_v13 }
 0x2c3   :  { %1093 = vmatpush1.bf16.msra.mxu1 %v1600_v14  ;;  %v628_v14 = vld [vmem:[#allocation12] sm:$0xff] }
 0x2c4   :  { %1094 = vmatprep.subr.bf16.mxu1 %v1608_v15  ;;  %v642_v15 = vsub.s32 2, %v633_v13 }
 0x2c7   :  { %1095 = vmatpush1.bf16.msra.mxu1 %v1606_v16  ;;  %v643_v16 = vrot.slane %v628_v14, %v642_v15 }
 0x2c8   :  { %1096 = vmatprep.subr.bf16.mxu1 %v1614_v17  ;;  %v650_v17 = vsub.s32 4, %v633_v13 }
 0x2cb   :  { %1097 = vmatpush1.bf16.msra.mxu1 %v1612_v18  ;;  %v651_v18 = vrot.slane %v628_v14, %v650_v17 }
 0x2cc   :  { %1098 = vmatprep.subr.bf16.mxu1 %v1620_v19  ;;  %v658_v19 = vsub.s32 6, %v633_v13 }
 0x2cf   :  { %1099 = vmatpush1.bf16.msra.mxu1 %v1618_v20  ;;  %v659_v20 = vrot.slane %v628_v14, %v658_v19 }
 0x2d0   :  { %1100 = vmatprep.subr.bf16.mxu1 %v1626_v22  ;;  %v635_v22 = vrot.slane %v628_v14, %v634_v21 }
 0x2d3   :  { %1101 = vmatpush1.bf16.msra.mxu1 %v1624_v24 }
 0x2d4   :  { %1168 = vmatprep.subr.bf16.mxu1 %v1632_v26 }
 0x376   :  { %v538_v29 = vpop.f32.mrf.mxu1 }
 0x377   :  { %v539_v30 = vadd.f32 %v1328_v28, %v538_v29 }
 0x378   :  { %v1517_v31 = vpop.f32.mrf.mxu1 }
 0x379   :  { %vm544_vm5 = vcmp.ge.f32.partialorder %v539_v30, 0.0  ;;  %v545_v32 = vmul.f32 0.05, %v539_v30 }
 0x37a   :  { %v541_v33 = vpop.f32.mrf.mxu1 }
 0x37b   :  { %v546_v34 = vsel %vm544_vm5, %v539_v30, %v545_v32  ;;  %v638_v32 = vsub.s32 1, %v633_v13  ;;  %v646_v33 = vsub.s32 3, %v633_v13 }
 0x37c   :  { %v1992_v37 = vpack.c.bf16 %v546_v34, %v546_v34  ;;  %v1518_v38 = vpop.f32.mrf.mxu1 }
 0x37d   :  { %v639_v34 = vrot.slane %v628_v14, %v638_v32 }
 0x37e   :  { %1078 = vmatmul.mubr.bf16.vlgmr.msra.gmra.mxu0 %v1992_v37  ;;  %1119 = vmatmul.mubr.bf16.vlgmr.msra.gmra.mxu1 %v1992_v37 }
 0x37f   :  { %1128 = vmatpush1.bf16.msra.mxu0 %v1627_v35  ;;  %1169 = vmatpush1.bf16.msra.mxu1 %v1630_v36  ;;  %v647_v35 = vrot.slane %v628_v14, %v646_v33  ;;  %v654_v36 = vsub.s32 5, %v633_v13 }
 0x380   :  { %1129 = vmatprep.subr.bf16.mxu0 %v1635_v39  ;;  %1170 = vmatprep.subr.bf16.mxu1 %v1638_v40 }
 0x381   :  { %1159 = vmatprep.mubr.bf16.mxu0 %v1852_v27  ;;  %1200 = vmatprep.mubr.bf16.mxu1 %v1852_v27 }
 0x383   :  { %1130 = vmatpush1.bf16.msra.mxu0 %v1633_v41  ;;  %1171 = vmatpush1.bf16.msra.mxu1 %v1636_v42  ;;  %v655_v42 = vrot.slane %v628_v14, %v654_v36 }
 0x384   :  { %1131 = vmatprep.subr.bf16.mxu0 %v1641_v43  ;;  %1172 = vmatprep.subr.bf16.mxu1 %v1644_v44 }
 0x387   :  { %1132 = vmatpush1.bf16.msra.mxu0 %v1639_v45  ;;  %1173 = vmatpush1.bf16.msra.mxu1 %v1642_v46 }
 0x388   :  { %1133 = vmatprep.subr.bf16.mxu0 %v1647_v47  ;;  %1174 = vmatprep.subr.bf16.mxu1 %v1650_v48 }
 0x38b   :  { %1134 = vmatpush1.bf16.msra.mxu0 %v1645_v49  ;;  %1175 = vmatpush1.bf16.msra.mxu1 %v1648_v50 }
 0x38c   :  { %1135 = vmatprep.subr.bf16.mxu0 %v1653_v51  ;;  %1176 = vmatprep.subr.bf16.mxu1 %v1656_v52 }
 0x38f   :  { %1136 = vmatpush1.bf16.msra.mxu0 %v1651_v53  ;;  %1177 = vmatpush1.bf16.msra.mxu1 %v1654_v54 }
 0x390   :  { %1137 = vmatprep.subr.bf16.mxu0 %v1659_v55  ;;  %1178 = vmatprep.subr.bf16.mxu1 %v1662_v56 }
 0x393   :  { %1138 = vmatpush1.bf16.msra.mxu0 %v1657_v57  ;;  %1179 = vmatpush1.bf16.msra.mxu1 %v1660_v58 }
 0x394   :  { %1139 = vmatprep.subr.bf16.mxu0 %v1665_v59  ;;  %1180 = vmatprep.subr.bf16.mxu1 %v1668_v60 }
 0x397   :  { %1140 = vmatpush1.bf16.msra.mxu0 %v1663_v61  ;;  %1181 = vmatpush1.bf16.msra.mxu1 %v1666_v62 }
 0x398   :  { %1141 = vmatprep.subr.bf16.mxu0 %v1671_v63  ;;  %1182 = vmatprep.subr.bf16.mxu1 %v1674_v1 }
 0x39b   :  { %1142 = vmatpush1.bf16.msra.mxu0 %v1669_v2  ;;  %1183 = vmatpush1.bf16.msra.mxu1 %v1672_v3 }
 0x39c   :  { %1519 = vmatprep.subr.bf16.mxu0 %v1850_v0 }
 0x39e   :  { %1160 = vmatmul.mubr.bf16.vlgmr.msra.gmra.mxu0 %v1992_v37  ;;  %1201 = vmatmul.mubr.bf16.vlgmr.msra.gmra.mxu1 %v1992_v37 }
 0x39f   :  { %1520 = vmatpush3.bf16.msra.mxu0 %v1675_v4  ;;  %1535 = vmatprep.mubr.msk.bf16.mxu0 %vm1851_vm0, %v1850_v0 }
 0x3a0   :  { %1521 = vmatprep.subr.bf16.mxu0 %v1850_v0 }
 0x3a3   :  { %1522 = vmatpush3.bf16.msra.mxu0 %v1676_v5 }
 0x3a4   :  { %1523 = vmatprep.subr.bf16.mxu0 %v1850_v0 }
 0x3a7   :  { %1524 = vmatpush3.bf16.msra.mxu0 %v1677_v6 }
 0x3a8   :  { %1525 = vmatprep.subr.bf16.mxu0 %v1850_v0 }
 0x3ab   :  { %1526 = vmatpush3.bf16.msra.mxu0 %v1678_v7 }
 0x3ac   :  { %1527 = vmatprep.subr.bf16.mxu0 %v1850_v0 }
 0x3af   :  { %1528 = vmatpush3.bf16.msra.mxu0 %v1679_v8 }
 0x3b0   :  { %1529 = vmatprep.subr.bf16.mxu0 %v1850_v0 }
 0x3b3   :  { %1530 = vmatpush3.bf16.msra.mxu0 %v1680_v9 }
 0x3b4   :  { %1531 = vmatprep.subr.bf16.mxu0 %v1850_v0 }
 0x3b7   :  { %1532 = vmatpush3.bf16.msra.mxu0 %v1681_v10  ;;  %v1337_v10 = vld [vmem:[#allocation12 + $0x8] ss:$0 sm:$0xff] }
 0x3b8   :  { %1533 = vmatprep.subr.bf16.mxu0 %v1850_v0 }
 0x3bb   :  { %1534 = vmatpush3.bf16.msra.mxu0 %v1682_v12 }
 0x3be   :  { %1536 = vmatmul.mubr.bf16.vlgmr.msra.gmra.mxu0 %v1992_v37  ;;  %v662_v37 = vsub.s32 7, %v633_v13 }
 0x3c0   :  { %v663_v43 = vrot.slane %v628_v14, %v662_v37 }
 0x43e   :  { %v1079_v23 = vpop.f32.mrf.mxu0  ;;  %v1120_v24 = vpop.f32.mrf.mxu1 }
 0x43f   :  { %v1080_v25 = vadd.f32 %v1079_v23, %v635_v22  ;;  %v1121_v26 = vadd.f32 %v1120_v24, %v643_v16 }
 0x440   :  { %v1081_v27 = vpop.f32.mrf.mxu0  ;;  %v1122_v28 = vpop.f32.mrf.mxu1 }
 0x441   :  { %1249 = vst [vmem:[%s2035_s11] sm:$0xff] %v1080_v25  ;;  %v1082_v38 = vadd.f32 %v1081_v27, %v639_v34  ;;  %v1123_v39 = vadd.f32 %v1122_v28, %v647_v35  ;;  %v1253_v44 = vmul.f32 0.05, %v1121_v26  ;;  %vm1251_vm6 = vcmp.ge.f32.partialorder %v1121_v26, 0.0 }
 0x442   :  { %v1083_v0 = vpop.f32.mrf.mxu0  ;;  %v1124_v29 = vpop.f32.mrf.mxu1 }
 0x443   :  { %v1252_v46 = vmul.f32 0.05, %v1082_v38  ;;  %v1258_v49 = vmul.f32 0.05, %v1123_v39  ;;  %vm1250_vm8 = vcmp.ge.f32.partialorder %v1082_v38, 0.0  ;;  %vm1256_vm9 = vcmp.ge.f32.partialorder %v1123_v39, 0.0 }
 0x444   :  { %v1084_v30 = vpop.f32.mrf.mxu0  ;;  %v1125_v31 = vpop.f32.mrf.mxu1  ;;  %v1255_v55 = vsel %vm1251_vm6, %v1121_v26, %v1253_v44 }
 0x445   :  { %v1254_v61 = vsel %vm1250_vm8, %v1082_v38, %v1252_v46  ;;  %v1260_v62 = vsel %vm1256_vm9, %v1123_v39, %v1258_v49 }
 0x446   :  { %v1262_v3 = vadd.f32 %v1260_v62, %v1254_v61 }
 0x45e   :  { %v1161_v40 = vpop.f32.mrf.mxu0  ;;  %v1202_v41 = vpop.f32.mrf.mxu1 }
 0x45f   :  { %v1162_v45 = vadd.f32 %v1161_v40, %v651_v18  ;;  %v1203_v8 = vadd.f32 %v1202_v41, %v659_v20 }
 0x460   :  { %v1163_v47 = vpop.f32.mrf.mxu0  ;;  %v1204_v48 = vpop.f32.mrf.mxu1 }
 0x461   :  { %vm1257_vm7 = vcmp.ge.f32.partialorder %v1162_v45, 0.0  ;;  %v1259_v50 = vmul.f32 0.05, %v1162_v45  ;;  %v1164_v51 = vadd.f32 %v1163_v47, %v655_v42  ;;  %v1205_v52 = vadd.f32 %v1204_v48, %v663_v43 }
 0x462   :  { %v1165_v53 = vpop.f32.mrf.mxu0  ;;  %v1206_v54 = vpop.f32.mrf.mxu1  ;;  %v1267_v12 = vmul.f32 0.05, %v1203_v8  ;;  %vm1265_vm12 = vcmp.ge.f32.partialorder %v1203_v8, 0.0 }
 0x463   :  { %v1261_v56 = vsel %vm1257_vm7, %v1162_v45, %v1259_v50  ;;  %vm1264_vm10 = vcmp.ge.f32.partialorder %v1164_v51, 0.0  ;;  %v1266_v58 = vmul.f32 0.05, %v1164_v51  ;;  %vm1270_vm11 = vcmp.ge.f32.partialorder %v1205_v52, 0.0 }
 0x464   :  { %v1263_v57 = vadd.f32 %v1261_v56, %v1255_v55  ;;  %v1166_v59 = vpop.f32.mrf.mxu0  ;;  %v1207_v60 = vpop.f32.mrf.mxu1  ;;  %v1272_v63 = vmul.f32 0.05, %v1205_v52  ;;  %v1269_v17 = vsel %vm1265_vm12, %v1203_v8, %v1267_v12 }
 0x465   :  { %v1268_v1 = vsel %vm1264_vm10, %v1164_v51, %v1266_v58 }
 0x466   :  { %v1274_v2 = vsel %vm1270_vm11, %v1205_v52, %v1272_v63 }
 0x467   :  { %v1276_v4 = vadd.f32 %v1274_v2, %v1268_v1 }
 0x469   :  { %v1278_v5 = vsub.f32 %v1262_v3, %v1276_v4 }
 0x46b   :  { %v1410_v6 = vmul.f32 -1.442695, %v1278_v5 }
 0x46d   :  { %1683 = vpow2.f32 %v1410_v6 }
 0x47a   :  { %v1684_v7 = vpop.eup %1683 }
 0x47b   :  { %v1286_v9 = vadd.f32 1.0, %v1684_v7 }
 0x47d   :  { %1685 = vrcp.f32 %v1286_v9 }
 0x47e   :  { %v1243_v11 = vpop.f32.mrf.mxu0 }
 0x47f   :  { %v1244_v13 = vadd.f32 %v1337_v10, %v1243_v11 }
 0x480   :  { %v1537_v14 = vpop.f32.mrf.mxu0 }
 0x481   :  { %vm1271_vm13 = vcmp.ge.f32.partialorder %v1244_v13, 0.0  ;;  %v1273_v15 = vmul.f32 0.05, %v1244_v13 }
 0x482   :  { %v1246_v16 = vpop.f32.mrf.mxu0 }
 0x483   :  { %v1275_v18 = vsel %vm1271_vm13, %v1244_v13, %v1273_v15 }
 0x484   :  { %v1277_v19 = vadd.f32 %v1275_v18, %v1269_v17  ;;  %v1538_v21 = vpop.f32.mrf.mxu0 }
 0x486   :  { %v1279_v22 = vsub.f32 %v1263_v57, %v1277_v19 }
 0x488   :  { %v1411_v23 = vmul.f32 -1.442695, %v1279_v22 }
 0x48a   :  { %1687 = vpow2.f32 %v1411_v23  ;;  %v1686_v24 = vpop.eup %1685 }
 0x48b   :  { %v1292_v20 = vsub.f32 1.0, %v1686_v24  ;;  %1294 = vst [vmem:[%s2035_s11 + $0x8] sm:$0xff] %v1686_v24 }
 0x48d   :  { %1296 = vst [vmem:[%s2035_s11 + $0x18] sm:$0xff] %v1292_v20 }
 0x497   :  { %v1688_v25 = vpop.eup %1687 }
 0x498   :  { %v1287_v26 = vadd.f32 1.0, %v1688_v25 }
 0x49a   :  { %1689 = vrcp.f32 %v1287_v26 }
 0x4a7   :  { %v1690_v27 = vpop.eup %1689 }
 0x4a8   :  { %v1293_v28 = vsub.f32 1.0, %v1690_v27  ;;  %1295 = vst [vmem:[%s2035_s11 + $0x10] sm:$0xff] %v1690_v27 }
 0x4aa   :  { %1297 = vst [vmem:[%s2035_s11 + $0x20] sm:$0xff] %v1293_v28 }
 0x4ab   :  { %1302 = vsyncpa [#allocation3], 1 }
 0x4ac   :  { %1303 = vsyncpa [#allocation5], 1 }
 0x4ad   :  { %1304 = vsyncpa [#allocation8], 1 }
 0x4ae   :  { %1305 = vsyncpa [#allocation11], 1 }

// kernel: rgadj_forward_node_edge.1
= control target key start
LH: loop header
LB: loop body
LE: loop exit
PB: predicated region body
PF: predicated region fallthrough
CT: control target
= control target key end

     0   :  { %16 = vsyncpa [#allocation3], 0  ;;  %s2024_s0 = inlined_call_operand.hbm [shape: f32[8,32], index: 0, kind: input, shape index: {}]   ;;  %s2025_s1 = inlined_call_operand.hbm [shape: bf16[32,128], index: 1, kind: input, shape index: {}]   ;;  %s2026_s2 = inlined_call_operand.vmem [shape: f32[1,128], index: 2, kind: input, shape index: {}]   ;;  %s2027_s3 = inlined_call_operand.hbm [shape: bf16[128,128], index: 3, kind: input, shape index: {}]   ;;  %s2028_s4 = inlined_call_operand.vmem [shape: f32[1,128], index: 4, kind: input, shape index: {}]   ;;  %s2029_s5 = inlined_call_operand.hbm [shape: bf16[128,128], index: 5, kind: input, shape index: {}]   ;;  %s2030_s6 = inlined_call_operand.vmem [shape: f32[1,128], index: 6, kind: input, shape index: {}]   ;;  %s2031_s7 = inlined_call_operand.hbm [shape: bf16[128,128], index: 7, kind: input, shape index: {}]   ;;  %s2032_s8 = inlined_call_operand.vmem [shape: f32[1,128], index: 8, kind: input, shape index: {}]   ;;  %s2033_s9 = inlined_call_operand.hbm [shape: bf16[128,1152], index: 9, kind: input, shape index: {}]   ;;  %s2034_s10 = inlined_call_operand.hbm [shape: f32[1,1152], index: 10, kind: input, shape index: {}]   ;;  %s2035_s11 = inlined_call_operand.vmem [shape: f32[8,640], index: 11, kind: output, shape index: {}]  }
   0x1   :  { %17 = vsyncpa [#allocation5], 0 }
   0x2   :  { %18 = vsyncpa [#allocation8], 0 }
   0x3   :  { %19 = vsyncpa [#allocation11], 0  ;;  %s1839_s17 = smov [#allocation4]  }
   0x4   :  { %s35_s18 = sshll.u32 %s1839_s17, 4  ;;  %s36_s18 = int_to_ptr.vmem [resolvable:$true] %s35_s18 }
   0x5   :  { %s1699_s19 = scalar_lea.vmem %s36_s18, 256  ;;  %p1704_p1 = scmp.lt.s32.totalorder %s36_s18, %s36_s18 }
   0x6   :  { %p1700_p0 = scmp.ne.s32.totalorder %s36_s18, %s1699_s19  ;;  %p1705_p2 = scmp.lt.s32.totalorder %s1699_s19, %s1699_s19 }
   0x8   :  { %p1706_p3 = por %p1705_p2, %p1704_p1 }
   0xa   :  { %p1707_p4 = pnand %p1706_p3, %p1700_p0 }
   0xc   :  { %1710 = shalt.err (!%p1707_p4)
}
   0xd   :  { %s1840_s20 = smov 64   ;;  %s1841_s21 = smov 4  }
   0xe   :  { %41 = dma.hbm_to_vmem [thread:$0]  %s2025_s1, 256, %s36_s18, [#allocation5], %s1840_s20, %s1840_s20, %s1841_s21  }
   0xf   :  { %s1842_s24 = smov [#allocation7]   ;;  %s1843_s26 = smov [#allocation10]  }
  0x10   :  { %s63_s25 = sshll.u32 %s1842_s24, 4  ;;  %s91_s27 = sshll.u32 %s1843_s26, 4  ;;  %s64_s25 = int_to_ptr.vmem [resolvable:$true] %s63_s25  ;;  %s92_s27 = int_to_ptr.vmem [resolvable:$true] %s91_s27 }
  0x11   :  { %s1719_s28 = scalar_lea.vmem %s64_s25, 1024  ;;  %p1724_p6 = scmp.lt.s32.totalorder %s64_s25, %s64_s25 }
  0x12   :  { %p1720_p5 = scmp.ne.s32.totalorder %s64_s25, %s1719_s28  ;;  %p1725_p7 = scmp.lt.s32.totalorder %s1719_s28, %s1719_s28 }
  0x14   :  { %p1726_p8 = por %p1725_p7, %p1724_p6 }
  0x16   :  { %p1727_p9 = pnand %p1726_p8, %p1720_p5 }
  0x18   :  { %1730 = shalt.err (!%p1727_p9)
}
  0x19   :  { %69 = dma.hbm_to_vmem [thread:$0]  %s2029_s5, 1024, %s64_s25, [#allocation8], %s1840_s20, %s1840_s20, %s1841_s21  }
  0x1a   :  { %s1739_s1 = scalar_lea.vmem %s92_s27, 9216  ;;  %p1744_p11 = scmp.lt.s32.totalorder %s92_s27, %s92_s27 }
  0x1b   :  { %p1740_p10 = scmp.ne.s32.totalorder %s92_s27, %s1739_s1  ;;  %p1745_p12 = scmp.lt.s32.totalorder %s1739_s1, %s1739_s1 }
  0x1d   :  { %p1746_p13 = por %p1745_p12, %p1744_p11 }
  0x1f   :  { %p1747_p0 = pnand %p1746_p13, %p1740_p10 }
  0x21   :  { %1750 = shalt.err (!%p1747_p0)
}
  0x22   :  { %s1844_s12 = smov 576   ;;  %s1845_s13 = smov 36  }
  0x23   :  { %97 = dma.hbm_to_vmem [thread:$0]  %s2033_s9, 9216, %s92_s27, [#allocation11], %s1844_s12, %s1844_s12, %s1845_s13  }
  0x24   :  { %s1846_s16 = smov [#allocation2]   ;;  %s1847_s18 = smov [#allocation6]  }
  0x25   :  { %s26_s17 = sshll.u32 %s1846_s16, 4  ;;  %s49_s19 = sshll.u32 %s1847_s18, 4  ;;  %s27_s17 = int_to_ptr.vmem [resolvable:$true] %s26_s17  ;;  %s50_s19 = int_to_ptr.vmem [resolvable:$true] %s49_s19 }
  0x26   :  { %s1759_s5 = scalar_lea.vmem %s27_s17, 128  ;;  %p1764_p2 = scmp.lt.s32.totalorder %s27_s17, %s27_s17 }
  0x27   :  { %p1760_p1 = scmp.ne.s32.totalorder %s27_s17, %s1759_s5  ;;  %p1765_p3 = scmp.lt.s32.totalorder %s1759_s5, %s1759_s5 }
  0x29   :  { %p1766_p4 = por %p1765_p3, %p1764_p2 }
  0x2b   :  { %p1767_p5 = pnand %p1766_p4, %p1760_p1 }
  0x2d   :  { %1770 = shalt.err (!%p1767_p5)
}
  0x2e   :  { %29 = dma.hbm_to_vmem [thread:$0]  %s2024_s0, 128, %s27_s17, [#allocation3]  }
  0x2f   :  { %s1779_s24 = scalar_lea.vmem %s50_s19, 1024  ;;  %p1784_p7 = scmp.lt.s32.totalorder %s50_s19, %s50_s19 }
  0x30   :  { %p1780_p6 = scmp.ne.s32.totalorder %s50_s19, %s1779_s24  ;;  %p1785_p8 = scmp.lt.s32.totalorder %s1779_s24, %s1779_s24 }
  0x32   :  { %p1786_p9 = por %p1785_p8, %p1784_p7 }
  0x34   :  { %p1787_p10 = pnand %p1786_p9, %p1780_p6 }
  0x36   :  { %1790 = shalt.err (!%p1787_p10)
}
  0x37   :  { %55 = dma.hbm_to_vmem [thread:$0]  %s2027_s3, 1024, %s50_s19, [#allocation5], %s1840_s20, %s1840_s20, %s1841_s21  }
  0x38   :  { %s1848_s26 = smov [#allocation9]   ;;  %s1849_s28 = smov [#allocation12]  }
  0x39   :  { %s77_s27 = sshll.u32 %s1848_s26, 4  ;;  %s104_s0 = sshll.u32 %s1849_s28, 4  ;;  %s78_s27 = int_to_ptr.vmem [resolvable:$true] %s77_s27  ;;  %s105_s0 = int_to_ptr.vmem [resolvable:$true] %s104_s0 }
  0x3a   :  { %s1799_s29 = scalar_lea.vmem %s78_s27, 1024  ;;  %p1804_p12 = scmp.lt.s32.totalorder %s78_s27, %s78_s27 }
  0x3b   :  { %p1800_p11 = scmp.ne.s32.totalorder %s78_s27, %s1799_s29  ;;  %p1805_p13 = scmp.lt.s32.totalorder %s1799_s29, %s1799_s29 }
  0x3d   :  { %p1806_p0 = por %p1805_p13, %p1804_p12 }
  0x3f   :  { %p1807_p1 = pnand %p1806_p0, %p1800_p11 }
  0x41   :  { %1810 = shalt.err (!%p1807_p1)
}
  0x42   :  { %83 = dma.hbm_to_vmem [thread:$0]  %s2031_s7, 1024, %s78_s27, [#allocation8], %s1840_s20, %s1840_s20, %s1841_s21  }
  0x43   :  { %s1819_s3 = scalar_lea.vmem %s105_s0, 144  ;;  %s1823_s12 = scalar_lea.vmem %s105_s0, 160 }
  0x44   :  { %p1820_p2 = scmp.ne.s32.totalorder %s105_s0, %s1819_s3  ;;  %p1824_p3 = scmp.lt.s32.totalorder %s105_s0, %s105_s0 }
  0x45   :  { %p1825_p4 = scmp.lt.s32.totalorder %s1823_s12, %s1819_s3 }
  0x47   :  { %p1826_p5 = por %p1825_p4, %p1824_p3 }
  0x49   :  { %p1827_p6 = pnand %p1826_p5, %p1820_p2 }
  0x4b   :  { %1830 = shalt.err (!%p1827_p6)
}
  0x4c   :  { %107 = dma.hbm_to_vmem [thread:$0]  %s2034_s10, 144, %s105_s0, [#allocation11]  }
  0x4d   :  { %1831 = dma.done.wait [#allocation3], 128  }
  0x4e   :  { %1832 = vsyncadd [#allocation3], 4294967168 }
  0x4f   :  { %1833 = dma.done.wait [#allocation5], 1280  }
  0x50   :  { %1834 = vsyncadd [#allocation5], 4294966016 }
  0x51   :  { %1835 = dma.done.wait [#allocation8], 2048  }
  0x52   :  { %1836 = vsyncadd [#allocation8], 4294965248 }
  0x53   :  { %1837 = dma.done.wait [#allocation11], 9360  }
  0x54   :  { %1838 = vsyncadd [#allocation11], 4294957936  ;;  %v1850_v0 = vmov 0.0   ;;  %vm1851_vm0 = vmmov 0   ;;  %v1553_v1 = vld [vmem:[#allocation4 + $0x8] sm:$0xff]   ;;  %v1554_v2 = vld [vmem:[#allocation4] sm:$0xff]  }
  0x55   :  { %1451 = vmatprep.subr.bf16.mxu0 %v1850_v0  ;;  %1455 = vmatprep.mubr.msk.bf16.mxu0 %vm1851_vm0, %v1850_v0  ;;  %v130_v3 = vld [vmem:[#allocation2] sm:$0xff]  ;;  %v1555_v4 = vld [vmem:[#allocation6 + $0x38] sm:$0xff]   ;;  %v1556_v6 = vld [vmem:[#allocation6 + $0x30] sm:$0xff]   ;;  %vm155_vm1 = vcmask 261120  }
  0x56   :  { %1459 = vmatprep.subr.bf16.mxu1 %v1850_v0  ;;  %1475 = vmatprep.mubr.msk.bf16.mxu1 %vm1851_vm0, %v1850_v0  ;;  %v131_v5 = vpack.c.bf16 %v130_v3, %v130_v3  ;;  %v1557_v7 = vld [vmem:[#allocation6 + $0x28] sm:$0xff]   ;;  %v1558_v8 = vld [vmem:[#allocation6 + $0x20] sm:$0xff]   ;;  %v1559_v9 = vld [vmem:[#allocation6 + $0x18] sm:$0xff]  }
  0x57   :  { %1452 = vmatpush3.bf16.msra.mxu0 %v1553_v1  ;;  %1460 = vmatpush3.bf16.msra.mxu1 %v1555_v4  ;;  %v1560_v10 = vld [vmem:[#allocation6 + $0x10] sm:$0xff]   ;;  %v1561_v11 = vld [vmem:[#allocation6 + $0x8] sm:$0xff]   ;;  %v1562_v12 = vld [vmem:[#allocation6] sm:$0xff]  }
  0x58   :  { %1453 = vmatprep.subr.bf16.mxu0 %v1850_v0  ;;  %1461 = vmatprep.subr.bf16.mxu1 %v1850_v0  ;;  %v1563_v13 = vld [vmem:[#allocation7 + $0x38] sm:$0xff]   ;;  %v1564_v14 = vld [vmem:[#allocation7 + $0x30] sm:$0xff]   ;;  %v1565_v15 = vld [vmem:[#allocation7 + $0x28] sm:$0xff]  }
  0x59   :  { %v1566_v16 = vld [vmem:[#allocation7 + $0x20] sm:$0xff]   ;;  %v1567_v17 = vld [vmem:[#allocation7 + $0x18] sm:$0xff]   ;;  %v1568_v18 = vld [vmem:[#allocation7 + $0x10] sm:$0xff]  }
  0x5a   :  { %v1306_v19 = vld [vmem:[%s2026_s2] ss:$0 sm:$0xff]  ;;  %v1570_v29 = vld [vmem:[#allocation7] sm:$0xff]   ;;  %v1571_v30 = vld [vmem:[#allocation9 + $0x38] sm:$0xff]  }
  0x5b   :  { %1454 = vmatpush3.bf16.msra.mxu0 %v1554_v2  ;;  %1462 = vmatpush3.bf16.msra.mxu1 %v1556_v6  ;;  %v1569_v28 = vld [vmem:[#allocation7 + $0x8] sm:$0xff]   ;;  %v1572_v31 = vld [vmem:[#allocation9 + $0x30] sm:$0xff]   ;;  %v1574_v33 = vld [vmem:[#allocation9 + $0x20] sm:$0xff]  }
  0x5c   :  { %1479 = vmatprep.subr.bf16.mxu0 %v1850_v0  ;;  %1463 = vmatprep.subr.bf16.mxu1 %v1850_v0  ;;  %v1573_v32 = vld [vmem:[#allocation9 + $0x28] sm:$0xff]   ;;  %v1575_v34 = vld [vmem:[#allocation9 + $0x18] sm:$0xff]   ;;  %v1576_v35 = vld [vmem:[#allocation9 + $0x10] sm:$0xff]  }
  0x5d   :  { %v1310_v36 = vld [vmem:[%s2028_s4] ss:$0 sm:$0xff]  ;;  %v1578_v46 = vld [vmem:[#allocation9] sm:$0xff]   ;;  %v1579_v47 = vld [vmem:[#allocation10 + $0x1f8] ss:$36 sps:$4 sm:$0xff]  }
  0x5e   :  { %1456 = vmatmul.mubr.msk.bf16.vlgmr.msra.gmra.mxu0 %vm155_vm1, %v131_v5  ;;  %v1577_v45 = vld [vmem:[#allocation9 + $0x8] sm:$0xff]   ;;  %v1581_v48 = vld [vmem:[#allocation10 + $0x1fc] ss:$36 sps:$4 sm:$0xff]   ;;  %v1587_v50 = vld [vmem:[#allocation10 + $0x1b4] ss:$36 sps:$4 sm:$0xff]  }
  0x5f   :  { %1495 = vmatprep.mubr.msk.bf16.mxu0 %vm1851_vm0, %v1850_v0  ;;  %1464 = vmatpush3.bf16.msra.mxu1 %v1557_v7  ;;  %v1584_v49 = vld [vmem:[#allocation10 + $0x204] ss:$36 sps:$4 sm:$0xff]   ;;  %v1585_v51 = vld [vmem:[#allocation10 + $0x1b0] ss:$36 sps:$4 sm:$0xff]   ;;  %v1605_v56 = vld [vmem:[#allocation10 + $0xdc] ss:$36 sps:$4 sm:$0xff]  }
  0x60   :  { %1465 = vmatprep.subr.bf16.mxu1 %v1850_v0  ;;  %1480 = vmatpush3.bf16.msra.mxu0 %v1563_v13  ;;  %v1593_v52 = vld [vmem:[#allocation10 + $0x16c] ss:$36 sps:$4 sm:$0xff]   ;;  %v1599_v54 = vld [vmem:[#allocation10 + $0x124] ss:$36 sps:$4 sm:$0xff]   ;;  %v1603_v57 = vld [vmem:[#allocation10 + $0xd8] ss:$36 sps:$4 sm:$0xff]  }
  0x61   :  { %1481 = vmatprep.subr.bf16.mxu0 %v1850_v0  ;;  %v1591_v53 = vld [vmem:[#allocation10 + $0x168] ss:$36 sps:$4 sm:$0xff]   ;;  %v1597_v55 = vld [vmem:[#allocation10 + $0x120] ss:$36 sps:$4 sm:$0xff]   ;;  %v1611_v58 = vld [vmem:[#allocation10 + $0x94] ss:$36 sps:$4 sm:$0xff]  }
  0x62   :  { %v1609_v59 = vld [vmem:[#allocation10 + $0x90] ss:$36 sps:$4 sm:$0xff]   ;;  %v1615_v61 = vld [vmem:[#allocation10 + $0x48] ss:$36 sps:$4 sm:$0xff]   ;;  %v1582_v6 = vld [vmem:[#allocation10 + $0x200] ss:$36 sps:$4 sm:$0xff]  }
  0x63   :  { %1466 = vmatpush3.bf16.msra.mxu1 %v1558_v8  ;;  %v1617_v60 = vld [vmem:[#allocation10 + $0x4c] ss:$36 sps:$4 sm:$0xff]   ;;  %v1319_v62 = vld [vmem:[%s2030_s6] ss:$0 sm:$0xff] }
  0x64   :  { %1467 = vmatprep.subr.bf16.mxu1 %v1850_v0  ;;  %1482 = vmatpush3.bf16.msra.mxu0 %v1564_v14  ;;  %v1602_v13 = vld [vmem:[#allocation10 + $0x12c] ss:$36 sps:$4 sm:$0xff]  }
  0x65   :  { %1483 = vmatprep.subr.bf16.mxu0 %v1850_v0  ;;  %v1600_v14 = vld [vmem:[#allocation10 + $0x128] ss:$36 sps:$4 sm:$0xff]  }
  0x67   :  { %1468 = vmatpush3.bf16.msra.mxu1 %v1559_v9  ;;  %v1590_v9 = vld [vmem:[#allocation10 + $0x1bc] ss:$36 sps:$4 sm:$0xff]  }
  0x68   :  { %1469 = vmatprep.subr.bf16.mxu1 %v1850_v0  ;;  %1484 = vmatpush3.bf16.msra.mxu0 %v1565_v15  ;;  %v1608_v15 = vld [vmem:[#allocation10 + $0xe4] ss:$36 sps:$4 sm:$0xff]  }
  0x69   :  { %1485 = vmatprep.subr.bf16.mxu0 %v1850_v0 }
  0x6b   :  { %1470 = vmatpush3.bf16.msra.mxu1 %v1560_v10  ;;  %v1588_v10 = vld [vmem:[#allocation10 + $0x1b8] ss:$36 sps:$4 sm:$0xff]  }
  0x6c   :  { %1471 = vmatprep.subr.bf16.mxu1 %v1850_v0  ;;  %1486 = vmatpush3.bf16.msra.mxu0 %v1566_v16  ;;  %v1606_v16 = vld [vmem:[#allocation10 + $0xe0] ss:$36 sps:$4 sm:$0xff]  }
  0x6d   :  { %1487 = vmatprep.subr.bf16.mxu0 %v1850_v0 }
  0x6f   :  { %1472 = vmatpush3.bf16.msra.mxu1 %v1561_v11  ;;  %v1596_v11 = vld [vmem:[#allocation10 + $0x174] ss:$36 sps:$4 sm:$0xff]  }
  0x70   :  { %1473 = vmatprep.subr.bf16.mxu1 %v1850_v0  ;;  %1488 = vmatpush3.bf16.msra.mxu0 %v1567_v17  ;;  %v1614_v17 = vld [vmem:[#allocation10 + $0x9c] ss:$36 sps:$4 sm:$0xff]  }
  0x71   :  { %1489 = vmatprep.subr.bf16.mxu0 %v1850_v0 }
  0x73   :  { %1474 = vmatpush3.bf16.msra.mxu1 %v1562_v12  ;;  %v1594_v12 = vld [vmem:[#allocation10 + $0x170] ss:$36 sps:$4 sm:$0xff]  }
  0x74   :  { %1499 = vmatprep.subr.bf16.mxu1 %v1850_v0  ;;  %1490 = vmatpush3.bf16.msra.mxu0 %v1568_v18  ;;  %v1612_v18 = vld [vmem:[#allocation10 + $0x98] ss:$36 sps:$4 sm:$0xff]  }
  0x75   :  { %1491 = vmatprep.subr.bf16.mxu0 %v1850_v0 }
  0x78   :  { %1492 = vmatpush3.bf16.msra.mxu0 %v1569_v28  ;;  %v1328_v28 = vld [vmem:[%s2032_s8] ss:$0 sm:$0xff] }
  0x79   :  { %1493 = vmatprep.subr.bf16.mxu0 %v1850_v0 }
  0x7c   :  { %1494 = vmatpush3.bf16.msra.mxu0 %v1570_v29 }
  0x7d   :  { %1045 = vmatprep.subr.bf16.mxu0 %v1581_v48  ;;  %v1650_v48 = vld [vmem:[#allocation10 + $0x13c] ss:$36 sps:$4 sm:$0xff]  }
 0x11e   :  { %v193_v20 = vpop.f32.mrf.mxu0 }
 0x11f   :  { %v194_v21 = vadd.f32 %v1306_v19, %v193_v20  ;;  %v1620_v19 = vld [vmem:[#allocation10 + $0x54] ss:$36 sps:$4 sm:$0xff]  }
 0x120   :  { %v1457_v22 = vpop.f32.mrf.mxu0  ;;  %v1618_v20 = vld [vmem:[#allocation10 + $0x50] ss:$36 sps:$4 sm:$0xff]  }
 0x121   :  { %vm199_vm2 = vcmp.ge.f32.partialorder %v194_v21, 0.0  ;;  %v200_v23 = vmul.f32 0.05, %v194_v21  ;;  %v1626_v22 = vld [vmem:[#allocation10 + $0xc] ss:$36 sps:$4 sm:$0xff]  }
 0x122   :  { %v196_v24 = vpop.f32.mrf.mxu0 }
 0x123   :  { %v201_v25 = vsel %vm199_vm2, %v194_v21, %v200_v23  ;;  %v1623_v21 = vld [vmem:[#allocation10 + $0x4] ss:$36 sps:$4 sm:$0xff]  }
 0x124   :  { %v1458_v26 = vpop.f32.mrf.mxu0  ;;  %v202_v27 = vpack.c.bf16 %v201_v25, %v201_v25  ;;  %v1621_v23 = vld [vmem:[#allocation10] ss:$36 sps:$4 sm:$0xff]   ;;  %v1624_v24 = vld [vmem:[#allocation10 + $0x8] ss:$36 sps:$4 sm:$0xff]  }
 0x125   :  { %v1629_v25 = vld [vmem:[#allocation10 + $0x20c] ss:$36 sps:$4 sm:$0xff]   ;;  %v1632_v26 = vld [vmem:[#allocation10 + $0x214] ss:$36 sps:$4 sm:$0xff]  }
 0x126   :  { %1476 = vmatmul.mubr.bf16.vlgmr.msra.gmra.mxu1 %v202_v27  ;;  %v1852_v27 = vmov 0  }
 0x127   :  { %1515 = vmatprep.mubr.msk.bf16.mxu1 %vm1851_vm0, %v1850_v0  ;;  %1500 = vmatpush3.bf16.msra.mxu1 %v1571_v30 }
 0x128   :  { %1501 = vmatprep.subr.bf16.mxu1 %v1850_v0 }
 0x12b   :  { %1502 = vmatpush3.bf16.msra.mxu1 %v1572_v31 }
 0x12c   :  { %1503 = vmatprep.subr.bf16.mxu1 %v1850_v0 }
 0x12f   :  { %1504 = vmatpush3.bf16.msra.mxu1 %v1573_v32 }
 0x130   :  { %1505 = vmatprep.subr.bf16.mxu1 %v1850_v0 }
 0x133   :  { %1506 = vmatpush3.bf16.msra.mxu1 %v1574_v33 }
 0x134   :  { %1507 = vmatprep.subr.bf16.mxu1 %v1850_v0 }
 0x137   :  { %1508 = vmatpush3.bf16.msra.mxu1 %v1575_v34 }
 0x138   :  { %1509 = vmatprep.subr.bf16.mxu1 %v1850_v0 }
 0x13b   :  { %1510 = vmatpush3.bf16.msra.mxu1 %v1576_v35  ;;  %v1627_v35 = vld [vmem:[#allocation10 + $0x208] ss:$36 sps:$4 sm:$0xff]  }
 0x13c   :  { %1511 = vmatprep.subr.bf16.mxu1 %v1850_v0 }
 0x13f   :  { %1512 = vmatpush3.bf16.msra.mxu1 %v1577_v45  ;;  %v1639_v45 = vld [vmem:[#allocation10 + $0x178] ss:$36 sps:$4 sm:$0xff]  }
 0x140   :  { %1513 = vmatprep.subr.bf16.mxu1 %v1850_v0 }
 0x143   :  { %1514 = vmatpush3.bf16.msra.mxu1 %v1578_v46  ;;  %v1642_v46 = vld [vmem:[#allocation10 + $0x180] ss:$36 sps:$4 sm:$0xff]  }
 0x144   :  { %1086 = vmatprep.subr.bf16.mxu1 %v1584_v49  ;;  %v1645_v49 = vld [vmem:[#allocation10 + $0x130] ss:$36 sps:$4 sm:$0xff]  }
 0x1e6   :  { %v308_v37 = vpop.f32.mrf.mxu1 }
 0x1e7   :  { %v309_v38 = vadd.f32 %v1310_v36, %v308_v37  ;;  %v1630_v36 = vld [vmem:[#allocation10 + $0x210] ss:$36 sps:$4 sm:$0xff]  }
 0x1e8   :  { %v1477_v39 = vpop.f32.mrf.mxu1 }
 0x1e9   :  { %vm314_vm3 = vcmp.ge.f32.partialorder %v309_v38, 0.0  ;;  %v315_v40 = vmul.f32 0.05, %v309_v38  ;;  %v1635_v39 = vld [vmem:[#allocation10 + $0x1c4] ss:$36 sps:$4 sm:$0xff]  }
 0x1ea   :  { %v311_v41 = vpop.f32.mrf.mxu1 }
 0x1eb   :  { %v316_v42 = vsel %vm314_vm3, %v309_v38, %v315_v40  ;;  %v1638_v40 = vld [vmem:[#allocation10 + $0x1cc] ss:$36 sps:$4 sm:$0xff]   ;;  %v1633_v41 = vld [vmem:[#allocation10 + $0x1c0] ss:$36 sps:$4 sm:$0xff]  }
 0x1ec   :  { %v317_v43 = vpack.c.bf16 %v316_v42, %v316_v42  ;;  %v1478_v44 = vpop.f32.mrf.mxu1  ;;  %v1636_v42 = vld [vmem:[#allocation10 + $0x1c8] ss:$36 sps:$4 sm:$0xff]  }
 0x1ed   :  { %v1644_v44 = vld [vmem:[#allocation10 + $0x184] ss:$36 sps:$4 sm:$0xff]  }
 0x1ee   :  { %1496 = vmatmul.mubr.bf16.vlgmr.msra.gmra.mxu0 %v317_v43  ;;  %v1641_v43 = vld [vmem:[#allocation10 + $0x17c] ss:$36 sps:$4 sm:$0xff]  }
 0x1ef   :  { %1046 = vmatpush1.bf16.msra.mxu0 %v1579_v47  ;;  %1077 = vmatprep.mubr.bf16.mxu0 %v1852_v27  ;;  %v1647_v47 = vld [vmem:[#allocation10 + $0x134] ss:$36 sps:$4 sm:$0xff]  }
 0x1f0   :  { %1047 = vmatprep.subr.bf16.mxu0 %v1587_v50  ;;  %v1648_v50 = vld [vmem:[#allocation10 + $0x138] ss:$36 sps:$4 sm:$0xff]  }
 0x1f3   :  { %1048 = vmatpush1.bf16.msra.mxu0 %v1585_v51  ;;  %v1653_v51 = vld [vmem:[#allocation10 + $0xec] ss:$36 sps:$4 sm:$0xff]  }
 0x1f4   :  { %1049 = vmatprep.subr.bf16.mxu0 %v1593_v52  ;;  %v1656_v52 = vld [vmem:[#allocation10 + $0xf4] ss:$36 sps:$4 sm:$0xff]  }
 0x1f7   :  { %1050 = vmatpush1.bf16.msra.mxu0 %v1591_v53  ;;  %v1651_v53 = vld [vmem:[#allocation10 + $0xe8] ss:$36 sps:$4 sm:$0xff]  }
 0x1f8   :  { %1051 = vmatprep.subr.bf16.mxu0 %v1599_v54  ;;  %v1654_v54 = vld [vmem:[#allocation10 + $0xf0] ss:$36 sps:$4 sm:$0xff]  }
 0x1fb   :  { %1052 = vmatpush1.bf16.msra.mxu0 %v1597_v55  ;;  %v1659_v55 = vld [vmem:[#allocation10 + $0xa4] ss:$36 sps:$4 sm:$0xff]  }
 0x1fc   :  { %1053 = vmatprep.subr.bf16.mxu0 %v1605_v56  ;;  %v1662_v56 = vld [vmem:[#allocation10 + $0xac] ss:$36 sps:$4 sm:$0xff]  }
 0x1ff   :  { %1054 = vmatpush1.bf16.msra.mxu0 %v1603_v57  ;;  %v1657_v57 = vld [vmem:[#allocation10 + $0xa0] ss:$36 sps:$4 sm:$0xff]  }
 0x200   :  { %1055 = vmatprep.subr.bf16.mxu0 %v1611_v58  ;;  %v1660_v58 = vld [vmem:[#allocation10 + $0xa8] ss:$36 sps:$4 sm:$0xff]  }
 0x203   :  { %1056 = vmatpush1.bf16.msra.mxu0 %v1609_v59  ;;  %v1665_v59 = vld [vmem:[#allocation10 + $0x5c] ss:$36 sps:$4 sm:$0xff]  }
 0x204   :  { %1057 = vmatprep.subr.bf16.mxu0 %v1617_v60  ;;  %v1668_v60 = vld [vmem:[#allocation10 + $0x64] ss:$36 sps:$4 sm:$0xff]  }
 0x207   :  { %1058 = vmatpush1.bf16.msra.mxu0 %v1615_v61  ;;  %v1663_v61 = vld [vmem:[#allocation10 + $0x58] ss:$36 sps:$4 sm:$0xff]  }
 0x208   :  { %1059 = vmatprep.subr.bf16.mxu0 %v1623_v21 }
 0x20b   :  { %1060 = vmatpush1.bf16.msra.mxu0 %v1621_v23 }
 0x20c   :  { %1127 = vmatprep.subr.bf16.mxu0 %v1629_v25 }
 0x2ae   :  { %v423_v63 = vpop.f32.mrf.mxu0 }
 0x2af   :  { %v424_v1 = vadd.f32 %v1319_v62, %v423_v63  ;;  %v1666_v62 = vld [vmem:[#allocation10 + $0x60] ss:$36 sps:$4 sm:$0xff]   ;;  %v1671_v63 = vld [vmem:[#allocation10 + $0x14] ss:$36 sps:$4 sm:$0xff]  }
 0x2b0   :  { %v1497_v2 = vpop.f32.mrf.mxu0 }
 0x2b1   :  { %vm429_vm4 = vcmp.ge.f32.partialorder %v424_v1, 0.0  ;;  %v430_v3 = vmul.f32 0.05, %v424_v1  ;;  %v1669_v2 = vld [vmem:[#allocation10 + $0x10] ss:$36 sps:$4 sm:$0xff]  }
 0x2b2   :  { %v426_v4 = vpop.f32.mrf.mxu0 }
 0x2b3   :  { %v431_v5 = vsel %vm429_vm4, %v424_v1, %v430_v3  ;;  %v1674_v1 = vld [vmem:[#allocation10 + $0x1c] ss:$36 sps:$4 sm:$0xff]  }
 0x2b4   :  { %v432_v7 = vpack.c.bf16 %v431_v5, %v431_v5  ;;  %v1498_v8 = vpop.f32.mrf.mxu0  ;;  %v1672_v3 = vld [vmem:[#allocation10 + $0x18] ss:$36 sps:$4 sm:$0xff]   ;;  %v1676_v5 = vld [vmem:[#allocation10 + $0x1d0] ss:$36 sps:$4 sm:$0xff]  }
 0x2b5   :  { %v1675_v4 = vld [vmem:[#allocation10 + $0x218] ss:$36 sps:$4 sm:$0xff]  }
 0x2b6   :  { %1516 = vmatmul.mubr.bf16.vlgmr.msra.gmra.mxu1 %v432_v7  ;;  %v1678_v7 = vld [vmem:[#allocation10 + $0x140] ss:$36 sps:$4 sm:$0xff]   ;;  %v1679_v8 = vld [vmem:[#allocation10 + $0xf8] ss:$36 sps:$4 sm:$0xff]  }
 0x2b7   :  { %1087 = vmatpush1.bf16.msra.mxu1 %v1582_v6  ;;  %1118 = vmatprep.mubr.bf16.mxu1 %v1852_v27  ;;  %v1677_v6 = vld [vmem:[#allocation10 + $0x188] ss:$36 sps:$4 sm:$0xff]  }
 0x2b8   :  { %1088 = vmatprep.subr.bf16.mxu1 %v1590_v9  ;;  %v1680_v9 = vld [vmem:[#allocation10 + $0xb0] ss:$36 sps:$4 sm:$0xff]  }
 0x2bb   :  { %1089 = vmatpush1.bf16.msra.mxu1 %v1588_v10  ;;  %v1681_v10 = vld [vmem:[#allocation10 + $0x68] ss:$36 sps:$4 sm:$0xff]  }
 0x2bc   :  { %1090 = vmatprep.subr.bf16.mxu1 %v1596_v11  ;;  %v632_v11 = vlaneseq }
 0x2bf   :  { %1091 = vmatpush1.bf16.msra.mxu1 %v1594_v12  ;;  %v1682_v12 = vld [vmem:[#allocation10 + $0x20] ss:$36 sps:$4 sm:$0xff]  }
 0x2c0   :  { %1092 = vmatprep.subr.bf16.mxu1 %v1602_v13  ;;  %v633_v13 = vshrl.u32 %v632_v11, 7 }
 0x2c2   :  { %v634_v21 = vsub.s32 0, %v633_v13 }
 0x2c3   :  { %1093 = vmatpush1.bf16.msra.mxu1 %v1600_v14  ;;  %v628_v14 = vld [vmem:[#allocation12] sm:$0xff] }
 0x2c4   :  { %1094 = vmatprep.subr.bf16.mxu1 %v1608_v15  ;;  %v642_v15 = vsub.s32 2, %v633_v13 }
 0x2c7   :  { %1095 = vmatpush1.bf16.msra.mxu1 %v1606_v16  ;;  %v643_v16 = vrot.slane %v628_v14, %v642_v15 }
 0x2c8   :  { %1096 = vmatprep.subr.bf16.mxu1 %v1614_v17  ;;  %v650_v17 = vsub.s32 4, %v633_v13 }
 0x2cb   :  { %1097 = vmatpush1.bf16.msra.mxu1 %v1612_v18  ;;  %v651_v18 = vrot.slane %v628_v14, %v650_v17 }
 0x2cc   :  { %1098 = vmatprep.subr.bf16.mxu1 %v1620_v19  ;;  %v658_v19 = vsub.s32 6, %v633_v13 }
 0x2cf   :  { %1099 = vmatpush1.bf16.msra.mxu1 %v1618_v20  ;;  %v659_v20 = vrot.slane %v628_v14, %v658_v19 }
 0x2d0   :  { %1100 = vmatprep.subr.bf16.mxu1 %v1626_v22  ;;  %v635_v22 = vrot.slane %v628_v14, %v634_v21 }
 0x2d3   :  { %1101 = vmatpush1.bf16.msra.mxu1 %v1624_v24 }
 0x2d4   :  { %1168 = vmatprep.subr.bf16.mxu1 %v1632_v26 }
 0x376   :  { %v538_v29 = vpop.f32.mrf.mxu1 }
 0x377   :  { %v539_v30 = vadd.f32 %v1328_v28, %v538_v29 }
 0x378   :  { %v1517_v31 = vpop.f32.mrf.mxu1 }
 0x379   :  { %vm544_vm5 = vcmp.ge.f32.partialorder %v539_v30, 0.0  ;;  %v545_v32 = vmul.f32 0.05, %v539_v30 }
 0x37a   :  { %v541_v33 = vpop.f32.mrf.mxu1 }
 0x37b   :  { %v546_v34 = vsel %vm544_vm5, %v539_v30, %v545_v32  ;;  %v638_v32 = vsub.s32 1, %v633_v13  ;;  %v646_v33 = vsub.s32 3, %v633_v13 }
 0x37c   :  { %v1992_v37 = vpack.c.bf16 %v546_v34, %v546_v34  ;;  %v1518_v38 = vpop.f32.mrf.mxu1 }
 0x37d   :  { %v639_v34 = vrot.slane %v628_v14, %v638_v32 }
 0x37e   :  { %1078 = vmatmul.mubr.bf16.vlgmr.msra.gmra.mxu0 %v1992_v37  ;;  %1119 = vmatmul.mubr.bf16.vlgmr.msra.gmra.mxu1 %v1992_v37 }
 0x37f   :  { %1128 = vmatpush1.bf16.msra.mxu0 %v1627_v35  ;;  %1169 = vmatpush1.bf16.msra.mxu1 %v1630_v36  ;;  %v647_v35 = vrot.slane %v628_v14, %v646_v33  ;;  %v654_v36 = vsub.s32 5, %v633_v13 }
 0x380   :  { %1129 = vmatprep.subr.bf16.mxu0 %v1635_v39  ;;  %1170 = vmatprep.subr.bf16.mxu1 %v1638_v40 }
 0x381   :  { %1159 = vmatprep.mubr.bf16.mxu0 %v1852_v27  ;;  %1200 = vmatprep.mubr.bf16.mxu1 %v1852_v27 }
 0x383   :  { %1130 = vmatpush1.bf16.msra.mxu0 %v1633_v41  ;;  %1171 = vmatpush1.bf16.msra.mxu1 %v1636_v42  ;;  %v655_v42 = vrot.slane %v628_v14, %v654_v36 }
 0x384   :  { %1131 = vmatprep.subr.bf16.mxu0 %v1641_v43  ;;  %1172 = vmatprep.subr.bf16.mxu1 %v1644_v44 }
 0x387   :  { %1132 = vmatpush1.bf16.msra.mxu0 %v1639_v45  ;;  %1173 = vmatpush1.bf16.msra.mxu1 %v1642_v46 }
 0x388   :  { %1133 = vmatprep.subr.bf16.mxu0 %v1647_v47  ;;  %1174 = vmatprep.subr.bf16.mxu1 %v1650_v48 }
 0x38b   :  { %1134 = vmatpush1.bf16.msra.mxu0 %v1645_v49  ;;  %1175 = vmatpush1.bf16.msra.mxu1 %v1648_v50 }
 0x38c   :  { %1135 = vmatprep.subr.bf16.mxu0 %v1653_v51  ;;  %1176 = vmatprep.subr.bf16.mxu1 %v1656_v52 }
 0x38f   :  { %1136 = vmatpush1.bf16.msra.mxu0 %v1651_v53  ;;  %1177 = vmatpush1.bf16.msra.mxu1 %v1654_v54 }
 0x390   :  { %1137 = vmatprep.subr.bf16.mxu0 %v1659_v55  ;;  %1178 = vmatprep.subr.bf16.mxu1 %v1662_v56 }
 0x393   :  { %1138 = vmatpush1.bf16.msra.mxu0 %v1657_v57  ;;  %1179 = vmatpush1.bf16.msra.mxu1 %v1660_v58 }
 0x394   :  { %1139 = vmatprep.subr.bf16.mxu0 %v1665_v59  ;;  %1180 = vmatprep.subr.bf16.mxu1 %v1668_v60 }
 0x397   :  { %1140 = vmatpush1.bf16.msra.mxu0 %v1663_v61  ;;  %1181 = vmatpush1.bf16.msra.mxu1 %v1666_v62 }
 0x398   :  { %1141 = vmatprep.subr.bf16.mxu0 %v1671_v63  ;;  %1182 = vmatprep.subr.bf16.mxu1 %v1674_v1 }
 0x39b   :  { %1142 = vmatpush1.bf16.msra.mxu0 %v1669_v2  ;;  %1183 = vmatpush1.bf16.msra.mxu1 %v1672_v3 }
 0x39c   :  { %1519 = vmatprep.subr.bf16.mxu0 %v1850_v0 }
 0x39e   :  { %1160 = vmatmul.mubr.bf16.vlgmr.msra.gmra.mxu0 %v1992_v37  ;;  %1201 = vmatmul.mubr.bf16.vlgmr.msra.gmra.mxu1 %v1992_v37 }
 0x39f   :  { %1520 = vmatpush3.bf16.msra.mxu0 %v1675_v4  ;;  %1535 = vmatprep.mubr.msk.bf16.mxu0 %vm1851_vm0, %v1850_v0 }
 0x3a0   :  { %1521 = vmatprep.subr.bf16.mxu0 %v1850_v0 }
 0x3a3   :  { %1522 = vmatpush3.bf16.msra.mxu0 %v1676_v5 }
 0x3a4   :  { %1523 = vmatprep.subr.bf16.mxu0 %v1850_v0 }
 0x3a7   :  { %1524 = vmatpush3.bf16.msra.mxu0 %v1677_v6 }
 0x3a8   :  { %1525 = vmatprep.subr.bf16.mxu0 %v1850_v0 }
 0x3ab   :  { %1526 = vmatpush3.bf16.msra.mxu0 %v1678_v7 }
 0x3ac   :  { %1527 = vmatprep.subr.bf16.mxu0 %v1850_v0 }
 0x3af   :  { %1528 = vmatpush3.bf16.msra.mxu0 %v1679_v8 }
 0x3b0   :  { %1529 = vmatprep.subr.bf16.mxu0 %v1850_v0 }
 0x3b3   :  { %1530 = vmatpush3.bf16.msra.mxu0 %v1680_v9 }
 0x3b4   :  { %1531 = vmatprep.subr.bf16.mxu0 %v1850_v0 }
 0x3b7   :  { %1532 = vmatpush3.bf16.msra.mxu0 %v1681_v10  ;;  %v1337_v10 = vld [vmem:[#allocation12 + $0x8] ss:$0 sm:$0xff] }
 0x3b8   :  { %1533 = vmatprep.subr.bf16.mxu0 %v1850_v0 }
 0x3bb   :  { %1534 = vmatpush3.bf16.msra.mxu0 %v1682_v12 }
 0x3be   :  { %1536 = vmatmul.mubr.bf16.vlgmr.msra.gmra.mxu0 %v1992_v37  ;;  %v662_v37 = vsub.s32 7, %v633_v13 }
 0x3c0   :  { %v663_v43 = vrot.slane %v628_v14, %v662_v37 }
 0x43e   :  { %v1079_v23 = vpop.f32.mrf.mxu0  ;;  %v1120_v24 = vpop.f32.mrf.mxu1 }
 0x43f   :  { %v1080_v25 = vadd.f32 %v1079_v23, %v635_v22  ;;  %v1121_v26 = vadd.f32 %v1120_v24, %v643_v16 }
 0x440   :  { %v1081_v27 = vpop.f32.mrf.mxu0  ;;  %v1122_v28 = vpop.f32.mrf.mxu1 }
 0x441   :  { %1249 = vst [vmem:[%s2035_s11] sm:$0xff] %v1080_v25  ;;  %v1082_v38 = vadd.f32 %v1081_v27, %v639_v34  ;;  %v1123_v39 = vadd.f32 %v1122_v28, %v647_v35  ;;  %v1253_v44 = vmul.f32 0.05, %v1121_v26  ;;  %vm1251_vm6 = vcmp.ge.f32.partialorder %v1121_v26, 0.0 }
 0x442   :  { %v1083_v0 = vpop.f32.mrf.mxu0  ;;  %v1124_v29 = vpop.f32.mrf.mxu1 }
 0x443   :  { %v1252_v46 = vmul.f32 0.05, %v1082_v38  ;;  %v1258_v49 = vmul.f32 0.05, %v1123_v39  ;;  %vm1250_vm8 = vcmp.ge.f32.partialorder %v1082_v38, 0.0  ;;  %vm1256_vm9 = vcmp.ge.f32.partialorder %v1123_v39, 0.0 }
 0x444   :  { %v1084_v30 = vpop.f32.mrf.mxu0  ;;  %v1125_v31 = vpop.f32.mrf.mxu1  ;;  %v1255_v55 = vsel %vm1251_vm6, %v1121_v26, %v1253_v44 }
 0x445   :  { %v1254_v61 = vsel %vm1250_vm8, %v1082_v38, %v1252_v46  ;;  %v1260_v62 = vsel %vm1256_vm9, %v1123_v39, %v1258_v49 }
 0x446   :  { %v1262_v3 = vadd.f32 %v1260_v62, %v1254_v61 }
 0x45e   :  { %v1161_v40 = vpop.f32.mrf.mxu0  ;;  %v1202_v41 = vpop.f32.mrf.mxu1 }
 0x45f   :  { %v1162_v45 = vadd.f32 %v1161_v40, %v651_v18  ;;  %v1203_v8 = vadd.f32 %v1202_v41, %v659_v20 }
 0x460   :  { %v1163_v47 = vpop.f32.mrf.mxu0  ;;  %v1204_v48 = vpop.f32.mrf.mxu1 }
 0x461   :  { %vm1257_vm7 = vcmp.ge.f32.partialorder %v1162_v45, 0.0  ;;  %v1259_v50 = vmul.f32 0.05, %v1162_v45  ;;  %v1164_v51 = vadd.f32 %v1163_v47, %v655_v42  ;;  %v1205_v52 = vadd.f32 %v1204_v48, %v663_v43 }
 0x462   :  { %v1165_v53 = vpop.f32.mrf.mxu0  ;;  %v1206_v54 = vpop.f32.mrf.mxu1  ;;  %v1267_v12 = vmul.f32 0.05, %v1203_v8  ;;  %vm1265_vm12 = vcmp.ge.f32.partialorder %v1203_v8, 0.0 }
 0x463   :  { %v1261_v56 = vsel %vm1257_vm7, %v1162_v45, %v1259_v50  ;;  %vm1264_vm10 = vcmp.ge.f32.partialorder %v1164_v51, 0.0  ;;  %v1266_v58 = vmul.f32 0.05, %v1164_v51  ;;  %vm1270_vm11 = vcmp.ge.f32.partialorder %v1205_v52, 0.0 }
 0x464   :  { %v1263_v57 = vadd.f32 %v1261_v56, %v1255_v55  ;;  %v1166_v59 = vpop.f32.mrf.mxu0  ;;  %v1207_v60 = vpop.f32.mrf.mxu1  ;;  %v1272_v63 = vmul.f32 0.05, %v1205_v52  ;;  %v1269_v17 = vsel %vm1265_vm12, %v1203_v8, %v1267_v12 }
 0x465   :  { %v1268_v1 = vsel %vm1264_vm10, %v1164_v51, %v1266_v58 }
 0x466   :  { %v1274_v2 = vsel %vm1270_vm11, %v1205_v52, %v1272_v63 }
 0x467   :  { %v1276_v4 = vadd.f32 %v1274_v2, %v1268_v1 }
 0x469   :  { %v1278_v5 = vsub.f32 %v1262_v3, %v1276_v4 }
 0x46b   :  { %v1410_v6 = vmul.f32 -1.442695, %v1278_v5 }
 0x46d   :  { %1683 = vpow2.f32 %v1410_v6 }
 0x47a   :  { %v1684_v7 = vpop.eup %1683 }
 0x47b   :  { %v1286_v9 = vadd.f32 1.0, %v1684_v7 }
 0x47d   :  { %1685 = vrcp.f32 %v1286_v9 }
 0x47e   :  { %v1243_v11 = vpop.f32.mrf.mxu0 }
 0x47f   :  { %v1244_v13 = vadd.f32 %v1337_v10, %v1243_v11 }
 0x480   :  { %v1537_v14 = vpop.f32.mrf.mxu0 }
 0x481   :  { %vm1271_vm13 = vcmp.ge.f32.partialorder %v1244_v13, 0.0  ;;  %v1273_v15 = vmul.f32 0.05, %v1244_v13 }
 0x482   :  { %v1246_v16 = vpop.f32.mrf.mxu0 }
 0x483   :  { %v1275_v18 = vsel %vm1271_vm13, %v1244_v13, %v1273_v15 }
 0x484   :  { %v1277_v19 = vadd.f32 %v1275_v18, %v1269_v17  ;;  %v1538_v21 = vpop.f32.mrf.mxu0 }
 0x486   :  { %v1279_v22 = vsub.f32 %v1263_v57, %v1277_v19 }
 0x488   :  { %v1411_v23 = vmul.f32 -1.442695, %v1279_v22 }
 0x48a   :  { %1687 = vpow2.f32 %v1411_v23  ;;  %v1686_v24 = vpop.eup %1685 }
 0x48b   :  { %v1292_v20 = vsub.f32 1.0, %v1686_v24  ;;  %1294 = vst [vmem:[%s2035_s11 + $0x8] sm:$0xff] %v1686_v24 }
 0x48d   :  { %1296 = vst [vmem:[%s2035_s11 + $0x18] sm:$0xff] %v1292_v20 }
 0x497   :  { %v1688_v25 = vpop.eup %1687 }
 0x498   :  { %v1287_v26 = vadd.f32 1.0, %v1688_v25 }
 0x49a   :  { %1689 = vrcp.f32 %v1287_v26 }
 0x4a7   :  { %v1690_v27 = vpop.eup %1689 }
 0x4a8   :  { %v1293_v28 = vsub.f32 1.0, %v1690_v27  ;;  %1295 = vst [vmem:[%s2035_s11 + $0x10] sm:$0xff] %v1690_v27 }
 0x4aa   :  { %1297 = vst [vmem:[%s2035_s11 + $0x20] sm:$0xff] %v1293_v28 }
 0x4ab   :  { %1302 = vsyncpa [#allocation3], 1 }
 0x4ac   :  { %1303 = vsyncpa [#allocation5], 1 }
 0x4ad   :  { %1304 = vsyncpa [#allocation8], 1 }
 0x4ae   :  { %1305 = vsyncpa [#allocation11], 1 }

</bundles_post_ra>
